<compile_context>
chip_gen: v7x
topology: tpu7x:2x2x1
jax: 0.10.0
libtpu: 0.0.40
codegen_flags: <defaults>
</compile_context>

<pallas_src>
import jax
import jax.numpy as jnp
import numpy as np
from jax import lax
from jax.experimental import pallas as pl
from jax.experimental.pallas import tpu as pltpu


def _pre_block_kernel(xe_ref, xo_ref, w10_ref, w12_ref, wev1_ref, wod1_ref,
                      b1_ref, b2_ref, o_ref):
    # xe/xo : (1, H+2, Wh, Cin) bf16  -- even / odd W columns, zero-padded by 1 row in H
    # w10   : (Cin, Cout)   bf16      -- conv1 tap kh=0
    # w12   : (Cin, Cout)   bf16      -- conv1 tap kh=2
    # wev1  : (Cin, 2*Cout) bf16      -- [conv1 kh=1 | conv2 kw=1]   (both consume x_ev)
    # wod1  : (Cin, 3*Cout) bf16      -- [conv1 kh=1 | conv2 kw=2 | conv2 kw=0]  (consume x_od)
    # b1/b2 : (1, Cout) f32
    # o     : (1, H, Wh, 2*Cout) f32
    _, Hp2, Wh, Cin = xe_ref.shape
    H = Hp2 - 2
    Cout = w10_ref.shape[1]
    M = H * Wh

    w10 = w10_ref[...]
    w12 = w12_ref[...]

    def taps(x_ref, w_mid):
        # Load the padded block once; the three H-shifted taps are slices along the untiled
        # leading dim (pure vreg selection, no extra VMEM loads / copies).
        x = x_ref[0]                                   # (H+2, Wh, Cin)
        x0 = x[0:H].reshape(M, Cin)
        x1 = x[1:H + 1].reshape(M, Cin)
        x2 = x[2:H + 2].reshape(M, Cin)
        d0 = jnp.dot(x0, w10, preferred_element_type=jnp.float32)
        d1 = jnp.dot(x1, w_mid, preferred_element_type=jnp.float32)
        d2 = jnp.dot(x2, w12, preferred_element_type=jnp.float32)
        return d0, d1, d2

    d_e0, d_e1, d_e2 = taps(xe_ref, wev1_ref[...])
    d_o0, d_o1, d_o2 = taps(xo_ref, wod1_ref[...])

    b1 = b1_ref[...]
    b2 = b2_ref[...]

    # conv1 + ReLU at even / odd W columns (tap sums + bias in f32).
    r1_ev = jnp.maximum(d_e0 + d_e1[:, 0:Cout] + d_e2 + b1, 0.0).reshape(H, Wh, Cout)
    r1_od = jnp.maximum(d_o0 + d_o1[:, 0:Cout] + d_o2 + b1, 0.0).reshape(H, Wh, Cout)

    # "value at column wo-1" shift along Wh; the wo==0 column is zeroed (conv left zero-pad,
    # and 0 == -inf pool padding since everything is post-ReLU).
    col0 = lax.broadcasted_iota(jnp.int32, (1, Wh, 1), 1) == 0

    def shift_w(t):                       # t: (H, Wh, C) -> t shifted by +1 along Wh
        return jnp.where(col0, 0.0, pltpu.roll(t, shift=1, axis=1))

    # branch 1: MaxPool (1,3), stride (1,2), pad (0,1)  ->  max over cols {2wo-1, 2wo, 2wo+1}.
    pool1 = jnp.maximum(r1_ev, jnp.maximum(r1_od, shift_w(r1_od)))

    # branch 2: kw=1 (even col) + kw=2 (odd col) + kw=0 (odd col shifted by one) + bias.
    m1 = shift_w(d_o1[:, 2 * Cout:3 * Cout].reshape(H, Wh, Cout))
    r2 = (d_e1[:, Cout:2 * Cout] + d_o1[:, Cout:2 * Cout] + b2).reshape(H, Wh, Cout)
    r2 = jnp.maximum(r2 + m1, 0.0)

    # single full-block store of the channel concat.
    o_ref[0] = jnp.concatenate([pool1, r2], axis=-1).astype(o_ref.dtype)


def pre_block_forward(x_nchw, w1, b1, w2, b2):
    """x_nchw: (N, 64, H, W) float32, W even.  Returns (N, 64, H, W//2) NCHW float32."""
    N, Cin, H, W = x_nchw.shape
    assert W % 2 == 0, "kernel assumes even input width"
    assert Cin == w1.shape[1] == w2.shape[1]
    Wh = W // 2
    Cout = w1.shape[0]

    # --- glue: stride-2 parity split, NCHW->NHWC, 1-row H halo pad, bf16 cast -------------
    x_ev = jnp.transpose(x_nchw[:, :, :, 0::2], (0, 2, 3, 1))          # (N, H, Wh, Cin)
    x_od = jnp.transpose(x_nchw[:, :, :, 1::2], (0, 2, 3, 1))
    hpad = ((0, 0), (1, 1), (0, 0), (0, 0))
    x_ev = jnp.pad(x_ev, hpad).astype(jnp.bfloat16)                    # (N, H+2, Wh, Cin)
    x_od = jnp.pad(x_od, hpad).astype(jnp.bfloat16)

    # torch conv weights (Cout, Cin, kh, kw) -> (k, Cin, Cout); fuse branch-2 taps with the
    # conv1 centre tap along output channels.
    w1k = jnp.transpose(w1[:, :, :, 0], (2, 1, 0)).astype(jnp.float32)  # (3, Cin, Cout)
    w2k = jnp.transpose(w2[:, :, 0, :], (2, 1, 0)).astype(jnp.float32)  # (3, Cin, Cout)
    w10 = w1k[0].astype(jnp.bfloat16)
    w12 = w1k[2].astype(jnp.bfloat16)
    wev1 = jnp.concatenate([w1k[1], w2k[1]], axis=1).astype(jnp.bfloat16)           # (Cin, 2*Cout)
    wod1 = jnp.concatenate([w1k[1], w2k[2], w2k[0]], axis=1).astype(jnp.bfloat16)   # (Cin, 3*Cout)
    b1k = b1.reshape(1, Cout).astype(jnp.float32)
    b2k = b2.reshape(1, Cout).astype(jnp.float32)

    x_spec = pl.BlockSpec((1, H + 2, Wh, Cin), lambda n: (n, 0, 0, 0))

    def w_spec(shape):
        return pl.BlockSpec(shape, lambda n: (0, 0))

    out = pl.pallas_call(
        _pre_block_kernel,
        out_shape=jax.ShapeDtypeStruct((N, H, Wh, 2 * Cout), jnp.float32),
        grid_spec=pltpu.PrefetchScalarGridSpec(
            num_scalar_prefetch=0,
            grid=(N,),
            in_specs=[x_spec, x_spec,
                      w_spec((Cin, Cout)), w_spec((Cin, Cout)),
                      w_spec((Cin, 2 * Cout)), w_spec((Cin, 3 * Cout)),
                      w_spec((1, Cout)), w_spec((1, Cout))],
            out_specs=pl.BlockSpec((1, H, Wh, 2 * Cout), lambda n: (n, 0, 0, 0)),
        ),
        compiler_params=pltpu.CompilerParams(dimension_semantics=("parallel",)),
    )(x_ev, x_od, w10, w12, wev1, wod1, b1k, b2k)

    # TODO(synk): for very large H*W on v7x (64 MiB VMEM, 2 TCs) add an H-tile grid axis with
    # a 1-row halo; whole-image blocks are fine at these sizes.
    return jnp.transpose(out, (0, 3, 1, 2))                            # NCHW


def ref_pre_block(x, w1, b1, w2, b2):
    """Pure-JAX reference mirroring the PyTorch module (NCHW, f32 accumulation)."""
    y1 = lax.conv_general_dilated(
        x, w1, window_strides=(1, 1), padding=((1, 1), (0, 0)),
        dimension_numbers=('NCHW', 'OIHW', 'NCHW'),
        preferred_element_type=jnp.float32)
    y1 = jnp.maximum(y1 + b1[None, :, None, None], 0.0)
    y1 = lax.reduce_window(
        y1, -jnp.inf, lax.max,
        window_dimensions=(1, 1, 1, 3), window_strides=(1, 1, 1, 2),
        padding=((0, 0), (0, 0), (0, 0), (1, 1)))
    y2 = lax.conv_general_dilated(
        x, w2, window_strides=(1, 2), padding=((0, 0), (1, 1)),
        dimension_numbers=('NCHW', 'OIHW', 'NCHW'),
        preferred_element_type=jnp.float32)
    y2 = jnp.maximum(y2 + b2[None, :, None, None], 0.0)
    return jnp.concatenate([y1, y2], axis=1)


if __name__ == "__main__":
    key = jax.random.PRNGKey(0)
    k_x, k_w1, k_b1, k_w2, k_b2 = jax.random.split(key, 5)

    N, Cin, H, W = 2, 64, 16, 32          # Cin is fixed to 64 by the module
    Cout = 32

    x = jax.random.normal(k_x, (N, Cin, H, W), jnp.float32)
    w1 = jax.random.normal(k_w1, (Cout, Cin, 3, 1), jnp.float32) * 0.05
    b1 = jax.random.normal(k_b1, (Cout,), jnp.float32) * 0.05
    w2 = jax.random.normal(k_w2, (Cout, Cin, 1, 3), jnp.float32) * 0.05
    b2 = jax.random.normal(k_b2, (Cout,), jnp.float32) * 0.05

    out = jax.block_until_ready(pre_block_forward(x, w1, b1, w2, b2))

    # Reference uses the same bf16 rounding of activations/weights that the kernel feeds the
    # MXU (f32 accumulation on both sides), so the comparison stays tight.
    rnd = lambda a: a.astype(jnp.bfloat16).astype(jnp.float32)
    ref = jax.block_until_ready(ref_pre_block(rnd(x), rnd(w1), b1, rnd(w2), b2))

    assert out.shape == (N, 2 * Cout, H, W // 2), out.shape
    np.testing.assert_allclose(np.asarray(out), np.asarray(ref), rtol=2e-3, atol=2e-3)
    print("KERNEL_OK")
</pallas_src>

<mosaic_0001>
module attributes {stable_mosaic.version = 11 : i64} {
  func.func @_pre_block_kernel(%arg0: i32, %arg1: memref<1x18x16x64xbf16, #tpu.memory_space<vmem>>, %arg2: memref<1x18x16x64xbf16, #tpu.memory_space<vmem>>, %arg3: memref<64x32xbf16, #tpu.memory_space<vmem>>, %arg4: memref<64x32xbf16, #tpu.memory_space<vmem>>, %arg5: memref<64x64xbf16, #tpu.memory_space<vmem>>, %arg6: memref<64x96xbf16, #tpu.memory_space<vmem>>, %arg7: memref<1x32xf32, #tpu.memory_space<vmem>>, %arg8: memref<1x32xf32, #tpu.memory_space<vmem>>, %arg9: memref<1x16x16x64xf32, #tpu.memory_space<vmem>>) attributes {dimension_semantics = [#tpu.dimension_semantics<parallel>], iteration_bounds = array<i64: 2>, scalar_prefetch = 0 : i64, scratch_operands = 0 : i64, tpu.core_type = #tpu.core_type<tc>, window_params = [{transform_indices = @transform_0, window_bounds = array<i64: 1, 18, 16, 64>}, {transform_indices = @transform_1, window_bounds = array<i64: 1, 18, 16, 64>}, {pipeline_mode = #tpu.pipeline_mode<synchronous>, transform_indices = @transform_2, window_bounds = array<i64: 64, 32>}, {pipeline_mode = #tpu.pipeline_mode<synchronous>, transform_indices = @transform_3, window_bounds = array<i64: 64, 32>}, {pipeline_mode = #tpu.pipeline_mode<synchronous>, transform_indices = @transform_4, window_bounds = array<i64: 64, 64>}, {pipeline_mode = #tpu.pipeline_mode<synchronous>, transform_indices = @transform_5, window_bounds = array<i64: 64, 96>}, {pipeline_mode = #tpu.pipeline_mode<synchronous>, transform_indices = @transform_6, window_bounds = array<i64: 1, 32>}, {pipeline_mode = #tpu.pipeline_mode<synchronous>, transform_indices = @transform_7, window_bounds = array<i64: 1, 32>}, {transform_indices = @transform_8, window_bounds = array<i64: 1, 16, 16, 64>}]} {
    %c0 = arith.constant 0 : index
    %c0_0 = arith.constant 0 : index
    %0 = vector.load %arg3[%c0, %c0_0] : memref<64x32xbf16, #tpu.memory_space<vmem>>, vector<64x32xbf16>
    %c0_1 = arith.constant 0 : index
    %c0_2 = arith.constant 0 : index
    %1 = vector.load %arg4[%c0_1, %c0_2] : memref<64x32xbf16, #tpu.memory_space<vmem>>, vector<64x32xbf16>
    %c0_3 = arith.constant 0 : index
    %c0_4 = arith.constant 0 : index
    %2 = vector.load %arg5[%c0_3, %c0_4] : memref<64x64xbf16, #tpu.memory_space<vmem>>, vector<64x64xbf16>
    %c0_5 = arith.constant 0 : index
    %c0_6 = arith.constant 0 : index
    %c0_7 = arith.constant 0 : index
    %c0_8 = arith.constant 0 : index
    %3 = vector.load %arg1[%c0_5, %c0_6, %c0_7, %c0_8] : memref<1x18x16x64xbf16, #tpu.memory_space<vmem>>, vector<1x18x16x64xbf16>
    %4 = vector.shape_cast %3 : vector<1x18x16x64xbf16> to vector<18x16x64xbf16>
    %5 = vector.extract_strided_slice %4 {offsets = [0, 0, 0], sizes = [16, 16, 64], strides = [1, 1, 1]} : vector<18x16x64xbf16> to vector<16x16x64xbf16>
    %6 = vector.shape_cast %5 : vector<16x16x64xbf16> to vector<256x64xbf16>
    %7 = vector.extract_strided_slice %4 {offsets = [1, 0, 0], sizes = [16, 16, 64], strides = [1, 1, 1]} : vector<18x16x64xbf16> to vector<16x16x64xbf16>
    %8 = vector.shape_cast %7 : vector<16x16x64xbf16> to vector<256x64xbf16>
    %9 = vector.extract_strided_slice %4 {offsets = [2, 0, 0], sizes = [16, 16, 64], strides = [1, 1, 1]} : vector<18x16x64xbf16> to vector<16x16x64xbf16>
    %10 = vector.shape_cast %9 : vector<16x16x64xbf16> to vector<256x64xbf16>
    %cst = arith.constant dense<0.000000e+00> : vector<256x32xf32>
    %11 = tpu.matmul %6, %0, %cst {dimension_numbers = #tpu.dot_dimension_numbers<[1], [0], [0], [1], [0, 0, 1, 1], [], []>} : vector<256x64xbf16>, vector<64x32xbf16>, vector<256x32xf32> -> vector<256x32xf32>
    %cst_9 = arith.constant dense<0.000000e+00> : vector<256x64xf32>
    %12 = tpu.matmul %8, %2, %cst_9 {dimension_numbers = #tpu.dot_dimension_numbers<[1], [0], [0], [1], [0, 0, 1, 1], [], []>} : vector<256x64xbf16>, vector<64x64xbf16>, vector<256x64xf32> -> vector<256x64xf32>
    %cst_10 = arith.constant dense<0.000000e+00> : vector<256x32xf32>
    %13 = tpu.matmul %10, %1, %cst_10 {dimension_numbers = #tpu.dot_dimension_numbers<[1], [0], [0], [1], [0, 0, 1, 1], [], []>} : vector<256x64xbf16>, vector<64x32xbf16>, vector<256x32xf32> -> vector<256x32xf32>
    %c0_11 = arith.constant 0 : index
    %c0_12 = arith.constant 0 : index
    %14 = vector.load %arg6[%c0_11, %c0_12] : memref<64x96xbf16, #tpu.memory_space<vmem>>, vector<64x96xbf16>
    %c0_13 = arith.constant 0 : index
    %c0_14 = arith.constant 0 : index
    %c0_15 = arith.constant 0 : index
    %c0_16 = arith.constant 0 : index
    %15 = vector.load %arg2[%c0_13, %c0_14, %c0_15, %c0_16] : memref<1x18x16x64xbf16, #tpu.memory_space<vmem>>, vector<1x18x16x64xbf16>
    %16 = vector.shape_cast %15 : vector<1x18x16x64xbf16> to vector<18x16x64xbf16>
    %17 = vector.extract_strided_slice %16 {offsets = [0, 0, 0], sizes = [16, 16, 64], strides = [1, 1, 1]} : vector<18x16x64xbf16> to vector<16x16x64xbf16>
    %18 = vector.shape_cast %17 : vector<16x16x64xbf16> to vector<256x64xbf16>
    %19 = vector.extract_strided_slice %16 {offsets = [1, 0, 0], sizes = [16, 16, 64], strides = [1, 1, 1]} : vector<18x16x64xbf16> to vector<16x16x64xbf16>
    %20 = vector.shape_cast %19 : vector<16x16x64xbf16> to vector<256x64xbf16>
    %21 = vector.extract_strided_slice %16 {offsets = [2, 0, 0], sizes = [16, 16, 64], strides = [1, 1, 1]} : vector<18x16x64xbf16> to vector<16x16x64xbf16>
    %22 = vector.shape_cast %21 : vector<16x16x64xbf16> to vector<256x64xbf16>
    %cst_17 = arith.constant dense<0.000000e+00> : vector<256x32xf32>
    %23 = tpu.matmul %18, %0, %cst_17 {dimension_numbers = #tpu.dot_dimension_numbers<[1], [0], [0], [1], [0, 0, 1, 1], [], []>} : vector<256x64xbf16>, vector<64x32xbf16>, vector<256x32xf32> -> vector<256x32xf32>
    %cst_18 = arith.constant dense<0.000000e+00> : vector<256x96xf32>
    %24 = tpu.matmul %20, %14, %cst_18 {dimension_numbers = #tpu.dot_dimension_numbers<[1], [0], [0], [1], [0, 0, 1, 1], [], []>} : vector<256x64xbf16>, vector<64x96xbf16>, vector<256x96xf32> -> vector<256x96xf32>
    %cst_19 = arith.constant dense<0.000000e+00> : vector<256x32xf32>
    %25 = tpu.matmul %22, %1, %cst_19 {dimension_numbers = #tpu.dot_dimension_numbers<[1], [0], [0], [1], [0, 0, 1, 1], [], []>} : vector<256x64xbf16>, vector<64x32xbf16>, vector<256x32xf32> -> vector<256x32xf32>
    %c0_20 = arith.constant 0 : index
    %c0_21 = arith.constant 0 : index
    %26 = vector.load %arg7[%c0_20, %c0_21] : memref<1x32xf32, #tpu.memory_space<vmem>>, vector<1x32xf32>
    %c0_22 = arith.constant 0 : index
    %c0_23 = arith.constant 0 : index
    %27 = vector.load %arg8[%c0_22, %c0_23] : memref<1x32xf32, #tpu.memory_space<vmem>>, vector<1x32xf32>
    %28 = vector.extract_strided_slice %12 {offsets = [0, 0], sizes = [256, 32], strides = [1, 1]} : vector<256x64xf32> to vector<256x32xf32>
    %29 = arith.addf %11, %28 : vector<256x32xf32>
    %30 = arith.addf %29, %13 : vector<256x32xf32>
    %31 = vector.broadcast %26 : vector<1x32xf32> to vector<256x32xf32>
    %32 = arith.addf %30, %31 : vector<256x32xf32>
    %cst_24 = arith.constant 0.000000e+00 : f32
    %33 = vector.broadcast %cst_24 : f32 to vector<256x32xf32>
    %34 = arith.maximumf %32, %33 : vector<256x32xf32>
    %35 = vector.shape_cast %34 : vector<256x32xf32> to vector<16x16x32xf32>
    %36 = vector.extract_strided_slice %24 {offsets = [0, 0], sizes = [256, 32], strides = [1, 1]} : vector<256x96xf32> to vector<256x32xf32>
    %37 = arith.addf %23, %36 : vector<256x32xf32>
    %38 = arith.addf %37, %25 : vector<256x32xf32>
    %39 = vector.broadcast %26 : vector<1x32xf32> to vector<256x32xf32>
    %40 = arith.addf %38, %39 : vector<256x32xf32>
    %cst_25 = arith.constant 0.000000e+00 : f32
    %41 = vector.broadcast %cst_25 : f32 to vector<256x32xf32>
    %42 = arith.maximumf %40, %41 : vector<256x32xf32>
    %43 = vector.shape_cast %42 : vector<256x32xf32> to vector<16x16x32xf32>
    %44 = tpu.iota {dimensions = array<i32: 1>} : vector<1x16x1xi32>
    %c0_i32 = arith.constant 0 : i32
    %45 = vector.broadcast %c0_i32 : i32 to vector<1x16x1xi32>
    %46 = arith.cmpi eq, %44, %45 : vector<1x16x1xi32>
    %c1_i32 = arith.constant 1 : i32
    %47 = tpu.dynamic_rotate %43 by %c1_i32 dim 1 : vector<16x16x32xf32>, i32 -> vector<16x16x32xf32>
    %cst_26 = arith.constant 0.000000e+00 : f32
    %48 = vector.shape_cast %46 : vector<1x16x1xi1> to vector<1x16x1xi1>
    %49 = vector.broadcast %48 : vector<1x16x1xi1> to vector<16x16x32xi1>
    %50 = vector.broadcast %cst_26 : f32 to vector<16x16x32xf32>
    %51 = arith.select %49, %50, %47 : vector<16x16x32xi1>, vector<16x16x32xf32>
    %52 = arith.maximumf %43, %51 : vector<16x16x32xf32>
    %53 = arith.maximumf %35, %52 : vector<16x16x32xf32>
    %54 = vector.extract_strided_slice %24 {offsets = [0, 64], sizes = [256, 32], strides = [1, 1]} : vector<256x96xf32> to vector<256x32xf32>
    %55 = vector.shape_cast %54 : vector<256x32xf32> to vector<16x16x32xf32>
    %c1_i32_27 = arith.constant 1 : i32
    %56 = tpu.dynamic_rotate %55 by %c1_i32_27 dim 1 : vector<16x16x32xf32>, i32 -> vector<16x16x32xf32>
    %cst_28 = arith.constant 0.000000e+00 : f32
    %57 = vector.shape_cast %46 : vector<1x16x1xi1> to vector<1x16x1xi1>
    %58 = vector.broadcast %57 : vector<1x16x1xi1> to vector<16x16x32xi1>
    %59 = vector.broadcast %cst_28 : f32 to vector<16x16x32xf32>
    %60 = arith.select %58, %59, %56 : vector<16x16x32xi1>, vector<16x16x32xf32>
    %61 = vector.extract_strided_slice %12 {offsets = [0, 32], sizes = [256, 32], strides = [1, 1]} : vector<256x64xf32> to vector<256x32xf32>
    %62 = vector.extract_strided_slice %24 {offsets = [0, 32], sizes = [256, 32], strides = [1, 1]} : vector<256x96xf32> to vector<256x32xf32>
    %63 = arith.addf %61, %62 : vector<256x32xf32>
    %64 = vector.broadcast %27 : vector<1x32xf32> to vector<256x32xf32>
    %65 = arith.addf %63, %64 : vector<256x32xf32>
    %66 = vector.shape_cast %65 : vector<256x32xf32> to vector<16x16x32xf32>
    %67 = arith.addf %66, %60 : vector<16x16x32xf32>
    %cst_29 = arith.constant 0.000000e+00 : f32
    %68 = vector.broadcast %cst_29 : f32 to vector<16x16x32xf32>
    %69 = arith.maximumf %67, %68 : vector<16x16x32xf32>
    %70 = tpu.concatenate %53, %69 in 2 : vector<16x16x32xf32>, vector<16x16x32xf32> -> vector<16x16x64xf32>
    %c0_30 = arith.constant 0 : index
    %c0_31 = arith.constant 0 : index
    %c0_32 = arith.constant 0 : index
    %c0_33 = arith.constant 0 : index
    %71 = vector.load %arg9[%c0_30, %c0_31, %c0_32, %c0_33] : memref<1x16x16x64xf32, #tpu.memory_space<vmem>>, vector<1x16x16x64xf32>
    %72 = vector.shape_cast %71 : vector<1x16x16x64xf32> to vector<16x16x64xf32>
    %73 = vector.shape_cast %70 : vector<16x16x64xf32> to vector<1x16x16x64xf32>
    tpu.vector_store %arg9[%c0_30, %c0_31, %c0_32, %c0_33], %73 {strides = array<i32>} : memref<1x16x16x64xf32, #tpu.memory_space<vmem>>, vector<1x16x16x64xf32>,
    return
  }
  func.func @transform_0(%arg0: i32) -> (i32, i32, i32, i32) {
    %c0_i32 = arith.constant 0 : i32
    %c0_i32_0 = arith.constant 0 : i32
    %c0_i32_1 = arith.constant 0 : i32
    %c0_i32_2 = arith.constant 0 : i32
    return %arg0, %c0_i32, %c0_i32_0, %c0_i32_1 : i32, i32, i32, i32
  }
  func.func @transform_1(%arg0: i32) -> (i32, i32, i32, i32) {
    %c0_i32 = arith.constant 0 : i32
    %c0_i32_0 = arith.constant 0 : i32
    %c0_i32_1 = arith.constant 0 : i32
    %c0_i32_2 = arith.constant 0 : i32
    return %arg0, %c0_i32, %c0_i32_0, %c0_i32_1 : i32, i32, i32, i32
  }
  func.func @transform_2(%arg0: i32) -> (i32, i32) {
    %c0_i32 = arith.constant 0 : i32
    %c0_i32_0 = arith.constant 0 : i32
    %c0_i32_1 = arith.constant 0 : i32
    return %c0_i32, %c0_i32_0 : i32, i32
  }
  func.func @transform_3(%arg0: i32) -> (i32, i32) {
    %c0_i32 = arith.constant 0 : i32
    %c0_i32_0 = arith.constant 0 : i32
    %c0_i32_1 = arith.constant 0 : i32
    return %c0_i32, %c0_i32_0 : i32, i32
  }
  func.func @transform_4(%arg0: i32) -> (i32, i32) {
    %c0_i32 = arith.constant 0 : i32
    %c0_i32_0 = arith.constant 0 : i32
    %c0_i32_1 = arith.constant 0 : i32
    return %c0_i32, %c0_i32_0 : i32, i32
  }
  func.func @transform_5(%arg0: i32) -> (i32, i32) {
    %c0_i32 = arith.constant 0 : i32
    %c0_i32_0 = arith.constant 0 : i32
    %c0_i32_1 = arith.constant 0 : i32
    return %c0_i32, %c0_i32_0 : i32, i32
  }
  func.func @transform_6(%arg0: i32) -> (i32, i32) {
    %c0_i32 = arith.constant 0 : i32
    %c0_i32_0 = arith.constant 0 : i32
    %c0_i32_1 = arith.constant 0 : i32
    return %c0_i32, %c0_i32_0 : i32, i32
  }
  func.func @transform_7(%arg0: i32) -> (i32, i32) {
    %c0_i32 = arith.constant 0 : i32
    %c0_i32_0 = arith.constant 0 : i32
    %c0_i32_1 = arith.constant 0 : i32
    return %c0_i32, %c0_i32_0 : i32, i32
  }
  func.func @transform_8(%arg0: i32) -> (i32, i32, i32, i32) {
    %c0_i32 = arith.constant 0 : i32
    %c0_i32_0 = arith.constant 0 : i32
    %c0_i32_1 = arith.constant 0 : i32
    %c0_i32_2 = arith.constant 0 : i32
    return %arg0, %c0_i32, %c0_i32_0, %c0_i32_1 : i32, i32, i32, i32
  }
}

</mosaic_0001>

<bundles_post_ra>
// kernel: tpu_custom_call.1
= control target key start
LH: loop header
LB: loop body
LE: loop exit
PB: predicated region body
PF: predicated region fallthrough
CT: control target
= control target key end

     0   :  { %s5404_s0 = inlined_call_operand.hbm [shape: bf16[2,18,16,64], index: 0, kind: input, shape index: {}]   ;;  %s5405_s1 = inlined_call_operand.hbm [shape: bf16[2,18,16,64], index: 1, kind: input, shape index: {}]   ;;  %s5406_s2 = inlined_call_operand.vmem [shape: bf16[64,32], index: 2, kind: input, shape index: {}]   ;;  %s5407_s3 = inlined_call_operand.vmem [shape: bf16[64,32], index: 3, kind: input, shape index: {}]   ;;  %s5408_s4 = inlined_call_operand.vmem [shape: bf16[64,64], index: 4, kind: input, shape index: {}]   ;;  %s5409_s5 = inlined_call_operand.vmem [shape: bf16[64,96], index: 5, kind: input, shape index: {}]   ;;  %s5410_s6 = inlined_call_operand.vmem [shape: f32[1,32], index: 6, kind: input, shape index: {}]   ;;  %s5411_s7 = inlined_call_operand.vmem [shape: f32[1,32], index: 7, kind: input, shape index: {}]   ;;  %s5412_s8 = inlined_call_operand.hbm [shape: f32[2,16,16,64], index: 8, kind: output, shape index: {}]  }
   0x1   :  { %5430 = sst [smem:[#allocation50_spill]] %s5404_s0 }
   0x2   :  { %13 = vsyncpa [#allocation3], 0 }
   0x3   :  { %15 = vsyncpa [#allocation3 + $0x1], 0 }
   0x4   :  { %16 = vsyncpa [#allocation6], 0 }
   0x5   :  { %18 = vsyncpa [#allocation6 + $0x1], 0 }
   0x6   :  { %19 = vsyncpa [#allocation4], 0 }
   0x7   :  { %21 = vsyncpa [#allocation4 + $0x1], 0  ;;  %s3804_s27 = smov 0   ;;  %s3806_s28 = smov 0  }
   0x8   :  { %s3808_s29 = smov 0   ;;  %s3810_s30 = smov 0  }
   0x9 LB: > { %5431 = sst [smem:[#allocation11_spill]] %s3744_s29  ;;  %s3825_s9 = sadd.s32 4294967295, %s3748_s30   ;;  %s3748_s30 = sphi %s3810_s30, %s5562_s30   ;;  %s3744_s29 = sphi %s3808_s29, %s5559_s29   ;;  %s3740_s28 = sphi %s3806_s28, %s5561_s28   ;;  %s3736_s27 = sphi %s3804_s27, %s5560_s27  }
   0xa   : > { %s2853_s10 = sadd.s32 4294967294, %s3748_s30   ;;  %s3829_s11 = sadd.s32 1, %s3748_s30  }
   0xb   : > { %s34_s12 = sadd.s32 1, %s3744_s29  ;;  %s31_s13 = ssub.s32 %s3748_s30, %s3829_s11 }
   0xc   : > { %p41_p0 = scmp.ne.s32.totalorder %s3744_s29, %s3740_s28  ;;  %p32_p1 = scmp.eq.s32.totalorder %s31_s13, 0 }
   0xd   : > { %p42_p2 = scmp.eq.s32.totalorder %s3748_s30, 0  ;;  %p47_p3 = scmp.ne.s32.totalorder %s3740_s28, %s3736_s27 }
   0xe   : > { %p48_p4 = scmp.eq.s32.totalorder %s3825_s9, 0  ;;  %p223_p7 = scmp.eq.s32.totalorder %s3825_s9, 1 }
   0xf   : > { %s3841_s14 = scalar_select %p32_p1, %s3744_s29, %s34_s12  }
  0x10   : > { %p43_p5 = por %p42_p2, %p41_p0  ;;  %p3843_p6 = por %p48_p4, %p47_p3 }
  0x11   : > { %5432 = sst [smem:[#allocation12_spill]] %s3841_s14  ;;  %p229_p8 = scmp.eq.s32.totalorder %s2853_s10, 1 }
  0x12   : > { %s5433_s15 = scalar_select %p3843_p6, 1, 0 }
  0x13   : > { %p3526_p10 = scmp.lt.s32.totalorder %s3748_s30, 2  ;;  %p3850_p11 = por %p223_p7, %p41_p0 }
  0x14   : > { %p3854_p12 = por %p229_p8, %p47_p3  ;;  %s3859_s18 = sand.u32 1, %s3744_s29  }
  0x15   : > { %s5434_s16 = scalar_select %p3850_p11, 1, 0 }
  0x16   : > { %s5435_s17 = scalar_select %p3854_p12, 1, 0 }
  0x17   : > { %s5413_s19 = smul.u32 2304, %s3748_s30  ;;  %s5436_s0 = sld [smem:[#allocation50_spill]] }
  0x18   : > { %s3504_s20 = smul.u32 144, %s3859_s18  ;;  %p3870_p13 = pnand %p3526_p10, %p43_p5 }
  0x19   : > { %s268_s10 = scalar_lea.sflag [#allocation3], %s3859_s18 }
  0x1a   : > { %s271_s25 = scalar_lea.vmem [#allocation2], %s3504_s20  ;;  %p3620_p1 = pneg %p3870_p13 }
  0x1b   : > { %s278_s26 = sshll.u32 %s271_s25, 4  ;;  %s3876_s26 = int_to_ptr.vmem [resolvable:$true] %s278_s26 }
  0x1d   : > { %s3868_s23 = scalar_lea.hbm %s5436_s0, %s5413_s19  ;;  %s3623_s22 = scalar_lea.hbm %s5436_s0, 4608 }
  0x1e   : > { %s3618_s12 = scalar_lea.hbm %s3868_s23, 2304  ;;  %p3624_p4 = scmp.lt.u32.totalorder %s3868_s23, %s5436_s0 }
  0x1f   : > { %p3619_p0 = scmp.ne.s32.totalorder %s3868_s23, %s3618_s12  ;;  %p3625_p5 = scmp.lt.u32.totalorder %s3623_s22, %s3618_s12 }
  0x20   : > { %p3627_p8 = scmp.lt.u32.totalorder %s3618_s12, %s3868_s23 }
  0x21   : > { %p3621_p2 = pnand %p3620_p1, %p3619_p0  ;;  %p3626_p7 = por %p3625_p5, %p3624_p4 }
  0x23   : > { %p3622_p3 = pneg %p3621_p2  ;;  %p3628_p10 = por %p3627_p8, %p3626_p7 }
  0x25   : > { %p3629_p9 = pnand %p3628_p10, %p3622_p3 }
  0x27   : > { %3632 = shalt.err (!%p3629_p9)
}
  0x28   : > { %s3633_s25 = scalar_lea.vmem %s3876_s26, 2304  ;;  %s3750_s13 = smov [#allocation2]  }
  0x29   : > { %p3634_p0 = scmp.ne.s32.totalorder %s3876_s26, %s3633_s25  ;;  %s3638_s21 = sshll.u32 %s3750_s13, 4  ;;  %s3639_s21 = int_to_ptr.vmem [resolvable:$false] %s3638_s21 }
  0x2a   : > { %s3640_s14 = scalar_lea.vmem %s3639_s21, 4608  ;;  %p3641_p11 = scmp.lt.s32.totalorder %s3876_s26, %s3639_s21 }
  0x2b   : > { %p3636_p2 = pnand %p3634_p0, %p3620_p1  ;;  %p3642_p4 = scmp.lt.s32.totalorder %s3640_s14, %s3633_s25 }
  0x2d   : > { %p3637_p12 = pneg %p3636_p2  ;;  %p3643_p5 = por %p3642_p4, %p3641_p11 }
  0x2f   : > { %p3644_p7 = pnand %p3643_p5, %p3637_p12 }
  0x31   : > { %3647 = shalt.err (!%p3644_p7)
}
  0x32   : > { %s5416_s19 = smov 64   ;;  %s3752_s12 = smov 4  }
  0x33   : > { %3518 = dma.hbm_to_vmem [thread:$0]  (!%p3870_p13), %s3868_s23, 2304, %s3876_s26, %s268_s10, %s5416_s19, %s5416_s19, %s3752_s12  }
  0x34   : > { %p2858_p9 = scmp.ge.s32.totalorder %s3748_s30, 1  ;;  %p307_p11 = scmp.lt.s32.totalorder %s3748_s30, 3 }
  0x35   : > { %s5439_s25 = smul.u32 2304, %s3748_s30  ;;  %s292_s0 = scalar_lea.vmem [#allocation5], %s3504_s20 }
  0x36   : > { %p3911_p12 = pnand %p2858_p9, %p307_p11  ;;  %s299_s29 = sshll.u32 %s292_s0, 4  ;;  %s3924_s29 = int_to_ptr.vmem [resolvable:$true] %s299_s29 }
  0x37   : > { %s3920_s14 = scalar_lea.hbm %s5405_s1, %s5439_s25  ;;  %s289_s23 = scalar_lea.sflag [#allocation6], %s3859_s18 }
  0x38   : > { %s3648_s26 = scalar_lea.hbm %s3920_s14, 2304  ;;  %s3653_s25 = scalar_lea.hbm %s5405_s1, 4608 }
  0x39   : > { %p3649_p3 = scmp.ne.s32.totalorder %s3920_s14, %s3648_s26  ;;  %p3654_p0 = scmp.lt.u32.totalorder %s3920_s14, %s5405_s1 }
  0x3a   : > { %p3655_p2 = scmp.lt.u32.totalorder %s3653_s25, %s3648_s26  ;;  %p3657_p5 = scmp.lt.u32.totalorder %s3648_s26, %s3920_s14 }
  0x3b   : > { %p3651_p8 = pnand %p3649_p3, %p3620_p1 }
  0x3c   : > { %p3656_p4 = por %p3655_p2, %p3654_p0 }
  0x3d   : > { %p3652_p10 = pneg %p3651_p8 }
  0x3e   : > { %p3658_p7 = por %p3657_p5, %p3656_p4 }
  0x40   : > { %p3659_p9 = pnand %p3658_p7, %p3652_p10 }
  0x42   : > { %3662 = shalt.err (!%p3659_p9)
}
  0x43   : > { %s3663_s0 = scalar_lea.vmem %s3924_s29, 2304  ;;  %s3753_s20 = smov [#allocation5]  }
  0x44   : > { %p3664_p11 = scmp.ne.s32.totalorder %s3924_s29, %s3663_s0  ;;  %s3668_s10 = sshll.u32 %s3753_s20, 4  ;;  %s3669_s10 = int_to_ptr.vmem [resolvable:$false] %s3668_s10 }
  0x45   : > { %s3670_s19 = scalar_lea.vmem %s3669_s10, 4608  ;;  %p3671_p6 = scmp.lt.s32.totalorder %s3924_s29, %s3669_s10 }
  0x46   : > { %p3666_p3 = pnand %p3664_p11, %p3620_p1  ;;  %p3672_p0 = scmp.lt.s32.totalorder %s3670_s19, %s3663_s0 }
  0x48   : > { %p3667_p8 = pneg %p3666_p3  ;;  %p3673_p2 = por %p3672_p0, %p3671_p6 }
  0x4a   : > { %p3674_p4 = pnand %p3673_p2, %p3667_p8 }
  0x4c   : > { %3677 = shalt.err (!%p3674_p4)
}
  0x4d   : > { %s5440_s26 = smov 64   ;;  %311 = sbr.rel (%p3911_p12) target bundleno = 770 (0x302), region = 52 }
  0x4e   : > { %3521 = dma.hbm_to_vmem [thread:$0]  (!%p3870_p13), %s3920_s14, 2304, %s3924_s29, %s289_s23, %s5440_s26, %s5440_s26, %s3752_s12  }
  0x54   : > { %s3958_s13 = sand.u32 1, %s3740_s28   ;;  %p5441_p6 = scmp.ne.s32.totalorder %s5433_s15, 0 }
  0x55   : > { %s3508_s25 = smul.u32 144, %s3958_s13  ;;  %s314_s21 = scalar_lea.sflag [#allocation3], %s3958_s13 }
  0x57   : > { %s3962_s24 = scalar_lea.vmem [#allocation2], %s3508_s25 }
  0x58   : > { %3723 = dma.done.wait (%p5441_p6), %s314_s21, 2304  }
  0x59   : > { %3725 = vsyncadd (%p5441_p6), %s314_s21, 4294964992  ;;  %s323_s29 = scalar_lea.sflag [#allocation6], %s3958_s13  ;;  %s3969_s18 = scalar_lea.vmem [#allocation5], %s3508_s25 }
  0x5a   : > { %3727 = dma.done.wait (%p5441_p6), %s323_s29, 2304  }
  0x5b   : > { %3729 = vsyncadd (%p5441_p6), %s323_s29, 4294964992  ;;  %v3566_v0 = vld [vmem:[%s5408_s4] sm:$0xff]   ;;  %v3568_v2 = vld [vmem:[%s5408_s4 + $0x8] sm:$0xff]   ;;  %vm529_vm0 = vcmask 523264   ;;  %s3754_s19 = smov 32   ;;  %s3755_s26 = smov 64  }
  0x5c   : > { %v3567_v1 = vld [vmem:[%s5407_s3] sm:$0xff]   ;;  %3136 = vmatprep.subr.bf16.mxu0 %v3566_v0  ;;  %v3569_v3 = vld [vmem:[%s5407_s3 + $0x8] sm:$0xff]   ;;  %v3570_v4 = vld [vmem:[%s5408_s4 + $0x10] sm:$0xff]   ;;  %s2859_s25 = sshll.u32 %s3958_s13, 8  ;;  %vm2678_vm3 = vcmask 261120   ;;  %s3015_s29 = sshll.u32 %s3825_s9, 12 }
  0x5d   : > { %3256 = vmatprep.subr.bf16.mxu1 %v3567_v1  ;;  %3137 = vmatpush3.bf16.msra.mxu0 %v3566_v0  ;;  %v3571_v5 = vld [vmem:[%s5407_s3 + $0x10] sm:$0xff]   ;;  %v3572_v6 = vld [vmem:[%s5408_s4 + $0x18] sm:$0xff]   ;;  %v3602_v23 = vld [vmem:[%s5406_s2] sm:$0xff]   ;;  %s5169_s21 = scalar_lea.vmem [#allocation7], %s2859_s25  ;;  %s5350_s23 = scalar_lea.hbm %s5412_s8, %s3015_s29 }
  0x5e   : > { %3257 = vmatpush3.bf16.msra.mxu1 %v3567_v1  ;;  %3138 = vmatprep.subr.bf16.mxu0 %v3568_v2  ;;  %v3573_v7 = vld [vmem:[%s5407_s3 + $0x18] sm:$0xff]   ;;  %v4003_v9 = vld [vmem:[%s3969_s18 + $0x10] sm:$0xff]   ;;  %v4019_v13 = vld [vmem:[%s3969_s18 + $0x20] sm:$0xff]   ;;  %s2757_s12 = sshll.u32 %s5169_s21, 4  ;;  %s2744_s9 = scalar_lea.sflag [#allocation4], %s3958_s13  ;;  %s5352_s12 = int_to_ptr.vmem [resolvable:$true] %s2757_s12 }
  0x5f   : > { %3258 = vmatprep.subr.bf16.mxu1 %v3569_v3  ;;  %v4000_v8 = vld [vmem:[%s3962_s24 + $0x8] sm:$0xff]   ;;  %3264 = vmatprep.mubr.msk.bf16.mxu1 %vm529_vm0, %v4003_v9  ;;  %v4010_v10 = vld [vmem:[%s3962_s24 + $0x10] sm:$0xff]   ;;  %v4013_v11 = vld [vmem:[%s3969_s18 + $0x18] sm:$0xff]   ;;  %s3678_s0 = scalar_lea.vmem %s5352_s12, 4096  ;;  %p5555_p1 = scmp.ne.s32.totalorder %s5434_s16, 0 }
  0x60   : > { %3144 = vmatprep.mubr.msk.bf16.mxu0 %vm529_vm0, %v4000_v8  ;;  %v4016_v12 = vld [vmem:[%s3962_s24 + $0x18] sm:$0xff]   ;;  %v4030_v14 = vld [vmem:[%s3962_s24 + $0x20] sm:$0xff]   ;;  %v4033_v15 = vld [vmem:[%s3969_s18 + $0x28] sm:$0xff]   ;;  %p3679_p13 = scmp.ne.s32.totalorder %s5352_s12, %s3678_s0  ;;  %s3756_s20 = smov [#allocation7]  }
  0x61   : > { %3139 = vmatpush3.bf16.msra.mxu0 %v3568_v2  ;;  %v4036_v16 = vld [vmem:[%s3962_s24 + $0x28] sm:$0xff]   ;;  %v4039_v17 = vld [vmem:[%s3969_s18 + $0x30] sm:$0xff]   ;;  %v4053_v19 = vld [vmem:[%s3969_s18 + $0x38] sm:$0xff]   ;;  %s3682_s10 = sshll.u32 %s3756_s20, 4  ;;  %s3683_s10 = int_to_ptr.vmem [resolvable:$false] %s3682_s10 }
  0x62   : > { %3259 = vmatpush3.bf16.msra.mxu1 %v3569_v3  ;;  %3140 = vmatprep.subr.bf16.mxu0 %v3570_v4  ;;  %v4050_v18 = vld [vmem:[%s3962_s24 + $0x30] sm:$0xff]   ;;  %v4056_v20 = vld [vmem:[%s3962_s24 + $0x38] sm:$0xff]   ;;  %v4059_v21 = vld [vmem:[%s3969_s18 + $0x40] sm:$0xff]   ;;  %p3680_p12 = pnand %p3679_p13, %p5555_p1  ;;  %s3684_s15 = scalar_lea.vmem %s3683_s10, 8192 }
  0x63   : > { %3260 = vmatprep.subr.bf16.mxu1 %v3571_v5  ;;  %v4070_v22 = vld [vmem:[%s3962_s24 + $0x40] sm:$0xff]   ;;  %v4078_v24 = vld [vmem:[%s5406_s2 + $0x8] sm:$0xff]   ;;  %v4087_v27 = vld [vmem:[%s3969_s18 + $0x50] sm:$0xff]   ;;  %p3685_p5 = scmp.lt.s32.totalorder %s5352_s12, %s3683_s10  ;;  %p3686_p7 = scmp.lt.s32.totalorder %s3684_s15, %s3678_s0 }
  0x64   : > { %v4081_v25 = vld [vmem:[%s3969_s18 + $0x48] sm:$0xff]   ;;  %v4095_v28 = vld [vmem:[%s5406_s2 + $0x10] sm:$0xff]   ;;  %v3611_v31 = vld [vmem:[%s5409_s5] sm:$0xff]   ;;  %p3681_p10 = pneg %p3680_p12 }
  0x65   : > { %3141 = vmatpush3.bf16.msra.mxu0 %v3570_v4  ;;  %v4084_v26 = vld [vmem:[%s3962_s24 + $0x48] sm:$0xff]   ;;  %v4104_v29 = vld [vmem:[%s3962_s24 + $0x50] sm:$0xff]   ;;  %v4115_v32 = vld [vmem:[%s3969_s18 + $0x58] sm:$0xff]   ;;  %p3687_p9 = por %p3686_p7, %p3685_p5 }
  0x66   : > { %3261 = vmatpush3.bf16.msra.mxu1 %v3571_v5  ;;  %3142 = vmatprep.subr.bf16.mxu0 %v3572_v6  ;;  %v3609_v30 = vld [vmem:[%s5406_s2 + $0x18] sm:$0xff]   ;;  %v4121_v34 = vld [vmem:[%s3969_s18 + $0x60] sm:$0xff]   ;;  %v4142_v38 = vld [vmem:[%s3969_s18 + $0x70] sm:$0xff]  }
  0x67   : > { %3262 = vmatprep.subr.bf16.mxu1 %v3573_v7  ;;  %v4118_v33 = vld [vmem:[%s3962_s24 + $0x58] sm:$0xff]   ;;  %v4133_v35 = vld [vmem:[%s3962_s24 + $0x60] sm:$0xff]   ;;  %v4136_v36 = vld [vmem:[%s3969_s18 + $0x68] sm:$0xff]   ;;  %p3688_p11 = pnand %p3687_p9, %p3681_p10 }
  0x68   : > { %v4139_v37 = vld [vmem:[%s3962_s24 + $0x68] sm:$0xff]   ;;  %v3600_v39 = vld [vmem:[%s3962_s24 + $0x70] sm:$0xff]   ;;  %v4154_v40 = vld [vmem:[%s3969_s18 + $0x78] sm:$0xff]  }
  0x69   : > { %3143 = vmatpush3.bf16.msra.mxu0 %v3572_v6  ;;  %v4157_v41 = vld [vmem:[%s3962_s24 + $0x78] sm:$0xff]   ;;  %v4160_v42 = vld [vmem:[%s3969_s18 + $0x80] sm:$0xff]   ;;  %v3607_v44 = vld [vmem:[%s3969_s18 + $0x88] sm:$0xff]  }
  0x6a   : > { %3263 = vmatpush3.bf16.msra.mxu1 %v3573_v7  ;;  %3176 = vmatprep.subr.bf16.mxu0 %v3567_v1  ;;  %v3606_v43 = vld [vmem:[%s3962_s24 + $0x80] sm:$0xff]   ;;  %v3612_v46 = vld [vmem:[%s5409_s5 + $0x8] sm:$0xff]   ;;  %v3614_v48 = vld [vmem:[%s5409_s5 + $0x18] sm:$0xff]  }
  0x6b   : > { %3296 = vmatprep.subr.bf16.mxu1 %v3602_v23  ;;  %v3610_v45 = vld [vmem:[%s3962_s24] sm:$0xff]   ;;  %v3615_v50 = vld [vmem:[%s3962_s24 + $0x88] sm:$0xff]  }
  0x6c   : > { %3145 = vmatmul.mubr.msk.bf16.vlgmr.msra.gmra.mrb[0].mxu0 %vm529_vm0, %v4010_v10  ;;  %v3613_v47 = vld [vmem:[%s5409_s5 + $0x10] sm:$0xff]   ;;  %v3009_v49 = vld [vmem:[%s5411_s7] ss:$0 sm:$0xff]  ;;  %v3616_v51 = vld [vmem:[%s3969_s18 + $0x8] sm:$0xff]  }
  0x6d   : > { %3265 = vmatmul.mubr.msk.bf16.vlgmr.msra.gmra.mrb[0].mxu1 %vm529_vm0, %v4013_v11  ;;  %3177 = vmatpush3.bf16.msra.mxu0 %v3567_v1  ;;  %v3617_v52 = vld [vmem:[%s3969_s18] sm:$0xff]  }
  0x6e   : > { %3148 = vmatprep.mubr.msk.bf16.mxu0 %vm529_vm0, %v4016_v12  ;;  %3268 = vmatprep.mubr.msk.bf16.mxu1 %vm529_vm0, %v4019_v13 }
  0x6f   : > { %3178 = vmatprep.subr.bf16.mxu0 %v3569_v3  ;;  %3297 = vmatpush3.bf16.msra.mxu1 %v3602_v23 }
  0x70   : > { %3298 = vmatprep.subr.bf16.mxu1 %v4078_v24  ;;  %2451 = vrot.lane.b32.xlu0 %v3009_v49, %s3754_s19 }
  0x71   : > { %3179 = vmatpush3.bf16.msra.mxu0 %v3569_v3 }
  0x72   : > { %3180 = vmatprep.subr.bf16.mxu0 %v3571_v5 }
  0x73   : > { %3299 = vmatpush3.bf16.msra.mxu1 %v4078_v24 }
  0x74   : > { %3149 = vmatmul.mubr.msk.bf16.gmra.mrb[4].mxu0 %vm529_vm0, %v4030_v14  ;;  %3300 = vmatprep.subr.bf16.mxu1 %v4095_v28 }
  0x75   : > { %3269 = vmatmul.mubr.msk.bf16.gmra.mrb[4].mxu1 %vm529_vm0, %v4033_v15  ;;  %3152 = vmatprep.mubr.msk.bf16.mxu0 %vm529_vm0, %v4036_v16 }
  0x76   : > { %3272 = vmatprep.mubr.msk.bf16.mxu1 %vm529_vm0, %v4039_v17  ;;  %3181 = vmatpush3.bf16.msra.mxu0 %v3571_v5 }
  0x77   : > { %3182 = vmatprep.subr.bf16.mxu0 %v3573_v7  ;;  %3301 = vmatpush3.bf16.msra.mxu1 %v4095_v28 }
  0x78   : > { %3302 = vmatprep.subr.bf16.mxu1 %v3609_v30 }
  0x7a   : > { %3183 = vmatpush3.bf16.msra.mxu0 %v3573_v7 }
  0x7b   : > { %3216 = vmatprep.subr.bf16.mxu0 %v3611_v31  ;;  %3303 = vmatpush3.bf16.msra.mxu1 %v3609_v30 }
  0x7c   : > { %3153 = vmatmul.mubr.msk.bf16.gmra.mrb[8].mxu0 %vm529_vm0, %v4050_v18  ;;  %3336 = vmatprep.subr.bf16.mxu1 %v3602_v23 }
  0x7d   : > { %3273 = vmatmul.mubr.msk.bf16.gmra.mrb[8].mxu1 %vm529_vm0, %v4053_v19  ;;  %3156 = vmatprep.mubr.msk.bf16.mxu0 %vm529_vm0, %v4056_v20 }
  0x7e   : > { %3276 = vmatprep.mubr.msk.bf16.mxu1 %vm529_vm0, %v4059_v21 }
  0x84   : > { %3157 = vmatmul.mubr.msk.bf16.gmra.mrb[12].mxu0 %vm529_vm0, %v4070_v22 }
  0x85   : > { %3277 = vmatmul.mubr.msk.bf16.gmra.mrb[12].mxu1 %vm529_vm0, %v4081_v25  ;;  %3160 = vmatprep.mubr.msk.bf16.mxu0 %vm529_vm0, %v4084_v26 }
  0x86   : > { %3280 = vmatprep.mubr.msk.bf16.mxu1 %vm529_vm0, %v4087_v27 }
  0x8c   : > { %3161 = vmatmul.mubr.msk.bf16.gmra.mrb[16].mxu0 %vm529_vm0, %v4104_v29 }
  0x8d   : > { %3281 = vmatmul.mubr.msk.bf16.gmra.mrb[16].mxu1 %vm529_vm0, %v4115_v32  ;;  %3164 = vmatprep.mubr.msk.bf16.mxu0 %vm529_vm0, %v4118_v33 }
  0x8e   : > { %3284 = vmatprep.mubr.msk.bf16.mxu1 %vm529_vm0, %v4121_v34 }
  0x94   : > { %3165 = vmatmul.mubr.msk.bf16.gmra.mrb[20].mxu0 %vm529_vm0, %v4133_v35 }
  0x95   : > { %3285 = vmatmul.mubr.msk.bf16.gmra.mrb[20].mxu1 %vm529_vm0, %v4136_v36  ;;  %3168 = vmatprep.mubr.msk.bf16.mxu0 %vm529_vm0, %v4139_v37 }
  0x96   : > { %3288 = vmatprep.mubr.msk.bf16.mxu1 %vm529_vm0, %v4142_v38 }
  0x9c   : > { %3169 = vmatmul.mubr.msk.bf16.gmra.mrb[24].mxu0 %vm529_vm0, %v3600_v39 }
  0x9d   : > { %3289 = vmatmul.mubr.msk.bf16.gmra.mrb[24].mxu1 %vm529_vm0, %v4154_v40  ;;  %3172 = vmatprep.mubr.msk.bf16.mxu0 %vm529_vm0, %v4157_v41 }
  0x9e   : > { %3292 = vmatprep.mubr.msk.bf16.mxu1 %vm529_vm0, %v4160_v42 }
  0xa4   : > { %3173 = vmatmul.mubr.msk.bf16.gmra.mrb[28].mxu0 %vm529_vm0, %v3606_v43 }
  0xa5   : > { %3293 = vmatmul.mubr.msk.bf16.gmra.mrb[28].mxu1 %vm529_vm0, %v3607_v44  ;;  %3184 = vmatprep.mubr.msk.bf16.mxu0 %vm529_vm0, %v4010_v10 }
  0xa6   : > { %3304 = vmatprep.mubr.msk.bf16.mxu1 %vm529_vm0, %v3610_v45 }
  0xac   : > { %3185 = vmatmul.mubr.msk.bf16.vlgmr.msra.gmra.mrb[32].mxu0 %vm529_vm0, %v4016_v12 }
  0xad   : > { %3305 = vmatmul.mubr.msk.bf16.vlgmr.msra.gmra.mrb[32].mxu1 %vm529_vm0, %v4000_v8  ;;  %3217 = vmatpush3.bf16.msra.mxu0 %v3611_v31 }
  0xae   : > { %3188 = vmatprep.mubr.msk.bf16.mxu0 %vm529_vm0, %v4030_v14  ;;  %3308 = vmatprep.mubr.msk.bf16.mxu1 %vm529_vm0, %v4010_v10 }
  0xaf   : > { %3218 = vmatprep.subr.bf16.mxu0 %v3612_v46  ;;  %3337 = vmatpush3.bf16.msra.mxu1 %v3602_v23 }
  0xb0   : > { %3338 = vmatprep.subr.bf16.mxu1 %v4078_v24 }
  0xb1   : > { %3219 = vmatpush3.bf16.msra.mxu0 %v3612_v46 }
  0xb2   : > { %3220 = vmatprep.subr.bf16.mxu0 %v3613_v47 }
  0xb3   : > { %3339 = vmatpush3.bf16.msra.mxu1 %v4078_v24 }
  0xb4   : > { %3189 = vmatmul.mubr.msk.bf16.gmra.mrb[36].mxu0 %vm529_vm0, %v4036_v16  ;;  %3340 = vmatprep.subr.bf16.mxu1 %v4095_v28 }
  0xb5   : > { %3309 = vmatmul.mubr.msk.bf16.gmra.mrb[36].mxu1 %vm529_vm0, %v4016_v12  ;;  %3192 = vmatprep.mubr.msk.bf16.mxu0 %vm529_vm0, %v4050_v18 }
  0xb6   : > { %3312 = vmatprep.mubr.msk.bf16.mxu1 %vm529_vm0, %v4030_v14  ;;  %3221 = vmatpush3.bf16.msra.mxu0 %v3613_v47 }
  0xb7   : > { %3222 = vmatprep.subr.bf16.mxu0 %v3614_v48  ;;  %3341 = vmatpush3.bf16.msra.mxu1 %v4095_v28 }
  0xb8   : > { %3342 = vmatprep.subr.bf16.mxu1 %v3609_v30 }
  0xba   : > { %3223 = vmatpush3.bf16.msra.mxu0 %v3614_v48 }
  0xbb   : > { %3343 = vmatpush3.bf16.msra.mxu1 %v3609_v30 }
  0xbc   : > { %3193 = vmatmul.mubr.msk.bf16.gmra.mrb[40].mxu0 %vm529_vm0, %v4056_v20 }
  0xbd   : > { %3313 = vmatmul.mubr.msk.bf16.gmra.mrb[40].mxu1 %vm529_vm0, %v4036_v16  ;;  %3196 = vmatprep.mubr.msk.bf16.mxu0 %vm529_vm0, %v4070_v22 }
  0xbe   : > { %3316 = vmatprep.mubr.msk.bf16.mxu1 %vm529_vm0, %v4050_v18 }
  0xc4   : > { %3197 = vmatmul.mubr.msk.bf16.gmra.mrb[44].mxu0 %vm529_vm0, %v4084_v26 }
  0xc5   : > { %3317 = vmatmul.mubr.msk.bf16.gmra.mrb[44].mxu1 %vm529_vm0, %v4056_v20  ;;  %3200 = vmatprep.mubr.msk.bf16.mxu0 %vm529_vm0, %v4104_v29 }
  0xc6   : > { %3320 = vmatprep.mubr.msk.bf16.mxu1 %vm529_vm0, %v4070_v22 }
  0xcc   : > { %3201 = vmatmul.mubr.msk.bf16.gmra.mrb[48].mxu0 %vm529_vm0, %v4118_v33 }
  0xcd   : > { %3321 = vmatmul.mubr.msk.bf16.gmra.mrb[48].mxu1 %vm529_vm0, %v4084_v26  ;;  %3204 = vmatprep.mubr.msk.bf16.mxu0 %vm529_vm0, %v4133_v35 }
  0xce   : > { %3324 = vmatprep.mubr.msk.bf16.mxu1 %vm529_vm0, %v4104_v29 }
  0xd4   : > { %3205 = vmatmul.mubr.msk.bf16.gmra.mrb[52].mxu0 %vm529_vm0, %v4139_v37 }
  0xd5   : > { %3325 = vmatmul.mubr.msk.bf16.gmra.mrb[52].mxu1 %vm529_vm0, %v4118_v33  ;;  %3208 = vmatprep.mubr.msk.bf16.mxu0 %vm529_vm0, %v3600_v39 }
  0xd6   : > { %3328 = vmatprep.mubr.msk.bf16.mxu1 %vm529_vm0, %v4133_v35 }
  0xdc   : > { %3209 = vmatmul.mubr.msk.bf16.gmra.mrb[56].mxu0 %vm529_vm0, %v4157_v41 }
  0xdd   : > { %3329 = vmatmul.mubr.msk.bf16.gmra.mrb[56].mxu1 %vm529_vm0, %v4139_v37  ;;  %3212 = vmatprep.mubr.msk.bf16.mxu0 %vm529_vm0, %v3606_v43 }
  0xde   : > { %3332 = vmatprep.mubr.msk.bf16.mxu1 %vm529_vm0, %v3600_v39 }
  0xe4   : > { %3213 = vmatmul.mubr.msk.bf16.gmra.mrb[60].mxu0 %vm529_vm0, %v3615_v50 }
  0xe5   : > { %3333 = vmatmul.mubr.msk.bf16.gmra.mrb[60].mxu1 %vm529_vm0, %v4157_v41  ;;  %3224 = vmatprep.mubr.msk.bf16.mxu0 %vm529_vm0, %v3616_v51 }
  0xe6   : > { %3344 = vmatprep.mubr.msk.bf16.mxu1 %vm529_vm0, %v3617_v52 }
  0xec   : > { %3225 = vmatmul.mubr.msk.bf16.vlgmr.msra.gmra.mrb[64].mxu0 %vm529_vm0, %v4003_v9 }
  0xed   : > { %3345 = vmatmul.mubr.msk.bf16.vlgmr.msra.gmra.mrb[0].mxu1 %vm529_vm0, %v3616_v51  ;;  %3228 = vmatprep.mubr.msk.bf16.mxu0 %vm529_vm0, %v4013_v11 }
  0xee   : > { %3348 = vmatprep.mubr.msk.bf16.mxu1 %vm529_vm0, %v4003_v9 }
  0xf4   : > { %3229 = vmatmul.mubr.msk.bf16.gmra.mrb[68].mxu0 %vm529_vm0, %v4019_v13 }
  0xf5   : > { %3349 = vmatmul.mubr.msk.bf16.gmra.mrb[4].mxu1 %vm529_vm0, %v4013_v11  ;;  %3232 = vmatprep.mubr.msk.bf16.mxu0 %vm529_vm0, %v4033_v15 }
  0xf6   : > { %3352 = vmatprep.mubr.msk.bf16.mxu1 %vm529_vm0, %v4019_v13 }
  0xfc   : > { %3233 = vmatmul.mubr.msk.bf16.gmra.mrb[72].mxu0 %vm529_vm0, %v4039_v17 }
  0xfd   : > { %3353 = vmatmul.mubr.msk.bf16.gmra.mrb[8].mxu1 %vm529_vm0, %v4033_v15  ;;  %3236 = vmatprep.mubr.msk.bf16.mxu0 %vm529_vm0, %v4053_v19 }
  0xfe   : > { %3356 = vmatprep.mubr.msk.bf16.mxu1 %vm529_vm0, %v4039_v17 }
 0x104   : > { %3237 = vmatmul.mubr.msk.bf16.gmra.mrb[76].mxu0 %vm529_vm0, %v4059_v21 }
 0x105   : > { %3357 = vmatmul.mubr.msk.bf16.gmra.mrb[12].mxu1 %vm529_vm0, %v4053_v19  ;;  %3240 = vmatprep.mubr.msk.bf16.mxu0 %vm529_vm0, %v4081_v25 }
 0x106   : > { %3360 = vmatprep.mubr.msk.bf16.mxu1 %vm529_vm0, %v4059_v21 }
 0x10c   : > { %3241 = vmatmul.mubr.msk.bf16.gmra.mrb[80].mxu0 %vm529_vm0, %v4087_v27 }
 0x10d   : > { %3361 = vmatmul.mubr.msk.bf16.gmra.mrb[16].mxu1 %vm529_vm0, %v4081_v25  ;;  %3244 = vmatprep.mubr.msk.bf16.mxu0 %vm529_vm0, %v4115_v32 }
 0x10e   : > { %3364 = vmatprep.mubr.msk.bf16.mxu1 %vm529_vm0, %v4087_v27 }
 0x114   : > { %3245 = vmatmul.mubr.msk.bf16.gmra.mrb[84].mxu0 %vm529_vm0, %v4121_v34 }
 0x115   : > { %3365 = vmatmul.mubr.msk.bf16.gmra.mrb[20].mxu1 %vm529_vm0, %v4115_v32  ;;  %3248 = vmatprep.mubr.msk.bf16.mxu0 %vm529_vm0, %v4136_v36 }
 0x116   : > { %3368 = vmatprep.mubr.msk.bf16.mxu1 %vm529_vm0, %v4121_v34 }
 0x11c   : > { %3249 = vmatmul.mubr.msk.bf16.gmra.mrb[88].mxu0 %vm529_vm0, %v4142_v38 }
 0x11d   : > { %3369 = vmatmul.mubr.msk.bf16.gmra.mrb[24].mxu1 %vm529_vm0, %v4136_v36  ;;  %3252 = vmatprep.mubr.msk.bf16.mxu0 %vm529_vm0, %v4154_v40 }
 0x11e   : > { %3372 = vmatprep.mubr.msk.bf16.mxu1 %vm529_vm0, %v4142_v38 }
 0x124   : > { %3253 = vmatmul.mubr.msk.bf16.gmra.mrb[92].mxu0 %vm529_vm0, %v4160_v42 }
 0x125   : > { %3373 = vmatmul.mubr.msk.bf16.gmra.mrb[28].mxu1 %vm529_vm0, %v4154_v40 }
 0x13f   : > { %v4314_v53 = vpop.f32.mrb[0].mxu0 }
 0x140   : > { %v4316_v54 = vpop.f32.mrb[1].mxu0 }
 0x141   : > { %v4318_v55 = vpop.f32.mrb[2].mxu0 }
 0x142   : > { %v4320_v56 = vpop.f32.mrb[3].mxu0 }
 0x147   : > { %v4322_v57 = vpop.f32.mrb[4].mxu0 }
 0x148   : > { %v4324_v58 = vpop.f32.mrb[5].mxu0 }
 0x149   : > { %v4326_v59 = vpop.f32.mrb[6].mxu0 }
 0x14a   : > { %v4328_v60 = vpop.f32.mrb[7].mxu0 }
 0x14f   : > { %v4330_v61 = vpop.f32.mrb[8].mxu0 }
 0x150   : > { %v4332_v62 = vpop.f32.mrb[9].mxu0 }
 0x151   : > { %v4334_v63 = vpop.f32.mrb[10].mxu0 }
 0x152   : > { %v4336_v0 = vpop.f32.mrb[11].mxu0 }
 0x157   : > { %v4338_v1 = vpop.f32.mrb[12].mxu0 }
 0x158   : > { %v4340_v2 = vpop.f32.mrb[13].mxu0 }
 0x159   : > { %v4342_v3 = vpop.f32.mrb[14].mxu0 }
 0x15a   : > { %v4344_v4 = vpop.f32.mrb[15].mxu0 }
 0x15b   : > { %5442 = vst [vmem:[#allocation13_spill] sm:$0xff] %v4344_v4 }
 0x15f   : > { %v4346_v5 = vpop.f32.mrb[16].mxu0 }
 0x160   : > { %5443 = vst [vmem:[#allocation14_spill] sm:$0xff] %v4346_v5  ;;  %v4348_v6 = vpop.f32.mrb[17].mxu0 }
 0x161   : > { %5444 = vst [vmem:[#allocation15_spill] sm:$0xff] %v4348_v6  ;;  %v4350_v7 = vpop.f32.mrb[18].mxu0 }
 0x162   : > { %5445 = vst [vmem:[#allocation16_spill] sm:$0xff] %v4350_v7  ;;  %v4352_v8 = vpop.f32.mrb[19].mxu0 }
 0x163   : > { %5446 = vst [vmem:[#allocation17_spill] sm:$0xff] %v4352_v8 }
 0x167   : > { %v4354_v9 = vpop.f32.mrb[20].mxu0 }
 0x168   : > { %5447 = vst [vmem:[#allocation18_spill] sm:$0xff] %v4354_v9  ;;  %v4356_v10 = vpop.f32.mrb[21].mxu0 }
 0x169   : > { %5448 = vst [vmem:[#allocation19_spill] sm:$0xff] %v4356_v10  ;;  %v4358_v11 = vpop.f32.mrb[22].mxu0 }
 0x16a   : > { %5449 = vst [vmem:[#allocation20_spill] sm:$0xff] %v4358_v11  ;;  %v4360_v12 = vpop.f32.mrb[23].mxu0 }
 0x16f   : > { %v4362_v13 = vpop.f32.mrb[24].mxu0 }
 0x170   : > { %v4364_v14 = vpop.f32.mrb[25].mxu0 }
 0x171   : > { %v4366_v15 = vpop.f32.mrb[26].mxu0 }
 0x172   : > { %v4368_v16 = vpop.f32.mrb[27].mxu0 }
 0x177   : > { %v4370_v17 = vpop.f32.mrb[28].mxu0 }
 0x178   : > { %5450 = vst [vmem:[#allocation21_spill] sm:$0xff] %v4370_v17  ;;  %v4372_v18 = vpop.f32.mrb[29].mxu0 }
 0x179   : > { %5451 = vst [vmem:[#allocation22_spill] sm:$0xff] %v4372_v18  ;;  %v4374_v19 = vpop.f32.mrb[30].mxu0 }
 0x17a   : > { %v4376_v20 = vpop.f32.mrb[31].mxu0 }
 0x17f   : > { %v3186_v21 = vpop.f32.mrb[32].mxu0 }
 0x180   : > { %v3376_v22 = vadd.f32 %v3186_v21, %v4314_v53  ;;  %v805_v23 = vpop.f32.mrb[33].mxu0  ;;  %v3306_v24 = vpop.f32.mrb[32].mxu1 }
 0x181   : > { %v3378_v25 = vadd.f32 %v805_v23, %v4316_v54  ;;  %v3187_v26 = vpop.f32.mrb[34].mxu0  ;;  %v1526_v27 = vpop.f32.mrb[33].mxu1 }
 0x182   : > { %v3380_v28 = vadd.f32 %v3187_v26, %v4318_v55  ;;  %v4381_v29 = vadd.f32 %v3376_v22, %v3306_v24  ;;  %v808_v30 = vpop.f32.mrb[35].mxu0  ;;  %v3307_v31 = vpop.f32.mrb[34].mxu1 }
 0x183   : > { %v3382_v32 = vadd.f32 %v808_v30, %v4320_v56  ;;  %v4384_v33 = vadd.f32 %v3378_v25, %v1526_v27  ;;  %v1529_v34 = vpop.f32.mrb[35].mxu1 }
 0x184   : > { %v4386_v35 = vadd.f32 %v3380_v28, %v3307_v31 }
 0x185   : > { %v4388_v36 = vadd.f32 %v3382_v32, %v1529_v34 }
 0x187   : > { %v3190_v37 = vpop.f32.mrb[36].mxu0 }
 0x188   : > { %v3384_v38 = vadd.f32 %v3190_v37, %v4322_v57  ;;  %v821_v39 = vpop.f32.mrb[37].mxu0  ;;  %v3310_v40 = vpop.f32.mrb[36].mxu1 }
 0x189   : > { %v3386_v41 = vadd.f32 %v821_v39, %v4324_v58  ;;  %v3191_v42 = vpop.f32.mrb[38].mxu0  ;;  %v1542_v43 = vpop.f32.mrb[37].mxu1 }
 0x18a   : > { %v3388_v44 = vadd.f32 %v3191_v42, %v4326_v59  ;;  %v4393_v45 = vadd.f32 %v3384_v38, %v3310_v40  ;;  %v824_v46 = vpop.f32.mrb[39].mxu0  ;;  %v3311_v47 = vpop.f32.mrb[38].mxu1 }
 0x18b   : > { %v3390_v48 = vadd.f32 %v824_v46, %v4328_v60  ;;  %v4396_v49 = vadd.f32 %v3386_v41, %v1542_v43  ;;  %v1545_v50 = vpop.f32.mrb[39].mxu1 }
 0x18c   : > { %v4398_v51 = vadd.f32 %v3388_v44, %v3311_v47 }
 0x18d   : > { %v4400_v52 = vadd.f32 %v3390_v48, %v1545_v50 }
 0x18f   : > { %v3194_v21 = vpop.f32.mrb[40].mxu0 }
 0x190   : > { %v3392_v22 = vadd.f32 %v3194_v21, %v4330_v61  ;;  %v837_v23 = vpop.f32.mrb[41].mxu0  ;;  %v3314_v24 = vpop.f32.mrb[40].mxu1 }
 0x191   : > { %v3394_v25 = vadd.f32 %v837_v23, %v4332_v62  ;;  %v3195_v26 = vpop.f32.mrb[42].mxu0  ;;  %v1558_v27 = vpop.f32.mrb[41].mxu1 }
 0x192   : > { %v3396_v28 = vadd.f32 %v3195_v26, %v4334_v63  ;;  %v4405_v30 = vadd.f32 %v3392_v22, %v3314_v24  ;;  %v840_v31 = vpop.f32.mrb[43].mxu0  ;;  %v3315_v32 = vpop.f32.mrb[42].mxu1 }
 0x193   : > { %v3398_v34 = vadd.f32 %v840_v31, %v4336_v0  ;;  %v4408_v37 = vadd.f32 %v3394_v25, %v1558_v27  ;;  %v1561_v38 = vpop.f32.mrb[43].mxu1 }
 0x194   : > { %v4410_v39 = vadd.f32 %v3396_v28, %v3315_v32 }
 0x195   : > { %v4412_v40 = vadd.f32 %v3398_v34, %v1561_v38 }
 0x197   : > { %v3198_v41 = vpop.f32.mrb[44].mxu0 }
 0x198   : > { %v3400_v42 = vadd.f32 %v3198_v41, %v4338_v1  ;;  %v853_v43 = vpop.f32.mrb[45].mxu0  ;;  %v3318_v44 = vpop.f32.mrb[44].mxu1 }
 0x199   : > { %v3402_v46 = vadd.f32 %v853_v43, %v4340_v2  ;;  %v3199_v47 = vpop.f32.mrb[46].mxu0  ;;  %v1574_v48 = vpop.f32.mrb[45].mxu1 }
 0x19a   : > { %v3404_v50 = vadd.f32 %v3199_v47, %v4342_v3  ;;  %v4417_v21 = vadd.f32 %v3400_v42, %v3318_v44  ;;  %v856_v22 = vpop.f32.mrb[47].mxu0  ;;  %v3319_v23 = vpop.f32.mrb[46].mxu1 }
 0x19b   : > { %v3406_v24 = vadd.f32 %v856_v22, %v4344_v4  ;;  %v4420_v25 = vadd.f32 %v3402_v46, %v1574_v48  ;;  %v1577_v26 = vpop.f32.mrb[47].mxu1 }
 0x19c   : > { %v4422_v27 = vadd.f32 %v3404_v50, %v3319_v23 }
 0x19d   : > { %v4424_v28 = vadd.f32 %v3406_v24, %v1577_v26 }
 0x19f   : > { %v3202_v31 = vpop.f32.mrb[48].mxu0 }
 0x1a0   : > { %v3408_v32 = vadd.f32 %v3202_v31, %v4346_v5  ;;  %v869_v34 = vpop.f32.mrb[49].mxu0  ;;  %v3322_v38 = vpop.f32.mrb[48].mxu1 }
 0x1a1   : > { %v3410_v41 = vadd.f32 %v869_v34, %v4348_v6  ;;  %v3203_v42 = vpop.f32.mrb[50].mxu0  ;;  %v1590_v43 = vpop.f32.mrb[49].mxu1 }
 0x1a2   : > { %v3412_v44 = vadd.f32 %v3203_v42, %v4350_v7  ;;  %v4429_v47 = vadd.f32 %v3408_v32, %v3322_v38  ;;  %v872_v46 = vpop.f32.mrb[51].mxu0  ;;  %v3323_v48 = vpop.f32.mrb[50].mxu1 }
 0x1a3   : > { %v3414_v50 = vadd.f32 %v872_v46, %v4352_v8  ;;  %v4432_v22 = vadd.f32 %v3410_v41, %v1590_v43  ;;  %v1593_v23 = vpop.f32.mrb[51].mxu1 }
 0x1a4   : > { %v4434_v24 = vadd.f32 %v3412_v44, %v3323_v48 }
 0x1a5   : > { %v4436_v26 = vadd.f32 %v3414_v50, %v1593_v23 }
 0x1a7   : > { %v3206_v31 = vpop.f32.mrb[52].mxu0 }
 0x1a8   : > { %v3416_v34 = vadd.f32 %v3206_v31, %v4354_v9  ;;  %v885_v6 = vpop.f32.mrb[53].mxu0  ;;  %v3326_v5 = vpop.f32.mrb[52].mxu1 }
 0x1a9   : > { %v3418_v42 = vadd.f32 %v885_v6, %v4356_v10  ;;  %v3207_v32 = vpop.f32.mrb[54].mxu0  ;;  %v1606_v38 = vpop.f32.mrb[53].mxu1 }
 0x1aa   : > { %v3420_v7 = vadd.f32 %v3207_v32, %v4358_v11  ;;  %v4441_v4 = vadd.f32 %v3416_v34, %v3326_v5  ;;  %v888_v41 = vpop.f32.mrb[55].mxu0  ;;  %v3327_v43 = vpop.f32.mrb[54].mxu1 }
 0x1ab   : > { %v3422_v44 = vadd.f32 %v888_v41, %v4360_v12  ;;  %v4444_v46 = vadd.f32 %v3418_v42, %v1606_v38  ;;  %v1609_v48 = vpop.f32.mrb[55].mxu1 }
 0x1ac   : > { %v4446_v50 = vadd.f32 %v3420_v7, %v3327_v43 }
 0x1ad   : > { %v4448_v23 = vadd.f32 %v3422_v44, %v1609_v48  ;;  %v4463_v48 = vld [vmem:[%s5410_s6] ss:$0 sm:$0xff] }
 0x1af   : > { %v3210_v31 = vpop.f32.mrb[56].mxu0 }
 0x1b0   : > { %v3424_v6 = vadd.f32 %v3210_v31, %v4362_v13  ;;  %v901_v10 = vpop.f32.mrb[57].mxu0  ;;  %v3330_v9 = vpop.f32.mrb[56].mxu1 }
 0x1b1   : > { %v3426_v32 = vadd.f32 %v901_v10, %v4364_v14  ;;  %v3211_v5 = vpop.f32.mrb[58].mxu0  ;;  %v1622_v34 = vpop.f32.mrb[57].mxu1 }
 0x1b2   : > { %v3428_v11 = vadd.f32 %v3211_v5, %v4366_v15  ;;  %v4453_v8 = vadd.f32 %v3424_v6, %v3330_v9  ;;  %v904_v42 = vpop.f32.mrb[59].mxu0  ;;  %v3331_v38 = vpop.f32.mrb[58].mxu1  ;;  %v2020_v5 = vlaneseq  ;;  %v4469_v9 = vadd.f32 %v4381_v29, %v4463_v48 }
 0x1b3   : > { %v3430_v7 = vadd.f32 %v904_v42, %v4368_v16  ;;  %v4456_v41 = vadd.f32 %v3426_v32, %v1622_v34  ;;  %v1625_v43 = vpop.f32.mrb[59].mxu1  ;;  %v4473_v6 = vadd.f32 %v4384_v33, %v4463_v48  ;;  %v4486_v29 = vadd.f32 %v4393_v45, %v4463_v48 }
 0x1b4   : > { %5452 = vst [vmem:[#allocation23_spill] sm:$0xff] %v4453_v8  ;;  %v4458_v44 = vadd.f32 %v3428_v11, %v3331_v38  ;;  %v4477_v11 = vadd.f32 %v4386_v35, %v4463_v48  ;;  %v4482_v38 = vadd.f32 %v4388_v36, %v4463_v48  ;;  %v4490_v33 = vadd.f32 %v4396_v49, %v4463_v48 }
 0x1b5   : > { %5453 = vst [vmem:[#allocation24_spill] sm:$0xff] %v4456_v41  ;;  %v4465_v10 = vadd.f32 %v3430_v7, %v1625_v43  ;;  %v4499_v36 = vadd.f32 %v4400_v52, %v4463_v48  ;;  %v4506_v49 = vadd.f32 %v4405_v30, %v4463_v48  ;;  %v4525_v30 = vshrl.u32 %v2020_v5, 7 }
 0x1b6   : > { %v4560_v5 = vadd.f32 %v4424_v28, %v4463_v48 }
 0x1b7   : > { %v3214_v31 = vpop.f32.mrb[60].mxu0  ;;  %5455 = vst [vmem:[#allocation26_spill] sm:$0xff] %v4506_v49  ;;  %vm2057_vm1 = vcmp.lt.s32.totalorder %v4525_v30, 1  ;;  %vm2023_vm2 = vcmp.eq.s32.totalorder %v4525_v30, 0 }
 0x1b8   : > { %v3432_v32 = vadd.f32 %v3214_v31, %v4370_v17  ;;  %v917_v34 = vpop.f32.mrb[61].mxu0  ;;  %v3334_v42 = vpop.f32.mrb[60].mxu1  ;;  %v4495_v31 = vadd.f32 %v4398_v51, %v4463_v48 }
 0x1b9   : > { %v3434_v7 = vadd.f32 %v917_v34, %v4372_v18  ;;  %v3215_v35 = vpop.f32.mrb[62].mxu0  ;;  %v1638_v43 = vpop.f32.mrb[61].mxu1  ;;  %v4510_v34 = vadd.f32 %v4408_v37, %v4463_v48 }
 0x1ba   : > { %v3436_v41 = vadd.f32 %v3215_v35, %v4374_v19  ;;  %v4502_v45 = vadd.f32 %v3432_v32, %v3334_v42  ;;  %v920_v8 = vpop.f32.mrb[63].mxu0  ;;  %v3335_v17 = vpop.f32.mrb[62].mxu1  ;;  %v4517_v35 = vadd.f32 %v4410_v39, %v4463_v48  ;;  %v4521_v32 = vadd.f32 %v4412_v40, %v4463_v48 }
 0x1bb   : > { %5456 = vst [vmem:[#allocation27_spill] sm:$0xff] %v4510_v34  ;;  %v3438_v51 = vadd.f32 %v920_v8, %v4376_v20  ;;  %v4513_v18 = vadd.f32 %v3434_v7, %v1638_v43  ;;  %v1641_v52 = vpop.f32.mrb[63].mxu1 }
 0x1bc   : > { %5454 = vst [vmem:[#allocation25_spill] sm:$0xff] %v4502_v45  ;;  %v4523_v42 = vadd.f32 %v3436_v41, %v3335_v17  ;;  %v4537_v17 = vadd.f32 %v4422_v27, %v4463_v48  ;;  %v4556_v45 = vadd.f32 %v4420_v25, %v4463_v48  ;;  %v4570_v25 = vadd.f32 %v4434_v24, %v4463_v48 }
 0x1bd   : > { %5457 = vst [vmem:[#allocation28_spill] sm:$0xff] %v4513_v18  ;;  %v4530_v7 = vadd.f32 %v3438_v51, %v1641_v52  ;;  %v4547_v18 = vadd.f32 %v4417_v21, %v4463_v48  ;;  %v4585_v24 = vadd.f32 %v4446_v50, %v4463_v48  ;;  %v4602_v50 = vadd.f32 %v4432_v22, %v4463_v48 }
 0x1be   : > { %5458 = vst [vmem:[#allocation29_spill] sm:$0xff] %v4523_v42 }
 0x1bf   : > { %5459 = vst [vmem:[#allocation30_spill] sm:$0xff] %v4530_v7  ;;  %v3226_v51 = vpop.f32.mrb[64].mxu0  ;;  %5464 = vst [vmem:[#allocation35_spill] sm:$0xff] %v4602_v50 }
 0x1c0   : > { %v4550_v27 = vadd.f32 %v3226_v51, %v4314_v53  ;;  %v3346_v39 = vpop.f32.mrb[0].mxu1  ;;  %2226 = vrot.lane.b32.xlu1 %v3226_v51, %s3755_s26  ;;  %v1162_v41 = vpop.f32.mrb[65].mxu0 }
 0x1c1   : > { %v1806_v21 = vadd.f32 %v3346_v39, %v3226_v51  ;;  %v4563_v37 = vadd.f32 %v1162_v41, %v4316_v54  ;;  %v1797_v53 = vpop.f32.mrb[1].mxu1  ;;  %2222 = vrot.lane.b32.xlu0 %v1162_v41, %s3755_s26  ;;  %v3227_v52 = vpop.f32.mrb[66].mxu0  ;;  %v4577_v54 = vadd.f32 %v4436_v26, %v4463_v48 }
 0x1c2   : > { %5460 = vst [vmem:[#allocation31_spill] sm:$0xff] %v4550_v27  ;;  %v1798_v43 = vadd.f32 %v1797_v53, %v1162_v41  ;;  %v4573_v28 = vadd.f32 %v3227_v52, %v4318_v55  ;;  %v3347_v39 = vpop.f32.mrb[2].mxu1  ;;  %v1165_v51 = vpop.f32.mrb[67].mxu0  ;;  %v4589_v55 = vadd.f32 %v4448_v23, %v4463_v48 }
 0x1c3   : > { %5461 = vst [vmem:[#allocation32_spill] sm:$0xff] %v4563_v37  ;;  %v1958_v8 = vadd.f32 %v4463_v48, %v1806_v21  ;;  %v1809_v37 = vadd.f32 %v3347_v39, %v3227_v52  ;;  %v4581_v27 = vadd.f32 %v1165_v51, %v4320_v56  ;;  %v1800_v40 = vpop.f32.mrb[3].mxu1  ;;  %v4596_v56 = vadd.f32 %v4429_v47, %v4463_v48 }
 0x1c4   : > { %5462 = vst [vmem:[#allocation33_spill] sm:$0xff] %v4573_v28  ;;  %v1956_v41 = vadd.f32 %v4463_v48, %v1798_v43  ;;  %v1801_v53 = vadd.f32 %v1800_v40, %v1165_v51  ;;  %2228 = vrot.lane.b32.xlu1 %v3227_v52, %s3755_s26  ;;  %v4609_v47 = vadd.f32 %v4441_v4, %v4463_v48 }
 0x1c5   : > { %5463 = vst [vmem:[#allocation34_spill] sm:$0xff] %v4581_v27  ;;  %v1990_v21 = vmax.f32 %v1958_v8, 0.0  ;;  %v1959_v39 = vadd.f32 %v4463_v48, %v1809_v37  ;;  %2224 = vrot.lane.b32.xlu0 %v1165_v51, %s3755_s26  ;;  %v4613_v37 = vadd.f32 %v4444_v46, %v4463_v48 }
 0x1c6   : > { %v1988_v43 = vmax.f32 %v1956_v41, 0.0  ;;  %v1957_v40 = vadd.f32 %v4463_v48, %v1801_v53  ;;  %5465 = vst [vmem:[#allocation36_spill] sm:$0xff] %v4609_v47 }
 0x1c7   : > { %5466 = vst [vmem:[#allocation37_spill] sm:$0xff] %v4613_v37  ;;  %v1991_v8 = vmax.f32 %v1959_v39, 0.0  ;;  %v3230_v51 = vpop.f32.mrb[68].mxu0  ;;  %v2026_v27 = vrot.slane %v1990_v21, 7 }
 0x1c8   : > { %v1989_v23 = vmax.f32 %v1957_v40, 0.0  ;;  %v4618_v41 = vadd.f32 %v3230_v51, %v4322_v57  ;;  %v3350_v53 = vpop.f32.mrb[4].mxu1  ;;  %v1178_v52 = vpop.f32.mrb[69].mxu0  ;;  %v2025_v34 = vrot.slane %v1988_v43, 7 }
 0x1c9   : > { %v2042_v28 = vrot.slane %v1991_v8, 7  ;;  %v1822_v4 = vadd.f32 %v3350_v53, %v3230_v51  ;;  %v4621_v7 = vadd.f32 %v1178_v52, %v4324_v58  ;;  %v1813_v46 = vpop.f32.mrb[5].mxu1  ;;  %2234 = vrot.lane.b32.xlu0 %v3230_v51, %s3755_s26  ;;  %v3231_v39 = vpop.f32.mrb[70].mxu0 }
 0x1ca   : > { %5467 = vst [vmem:[#allocation38_spill] sm:$0xff] %v4618_v41  ;;  %v2041_v22 = vrot.slane %v1989_v23, 7  ;;  %v1814_v42 = vadd.f32 %v1813_v46, %v1178_v52  ;;  %v4625_v40 = vadd.f32 %v3231_v39, %v4326_v59  ;;  %v3351_v57 = vpop.f32.mrb[6].mxu1  ;;  %2236 = vrot.lane.b32.xlu1 %v3231_v39, %s3755_s26  ;;  %v1181_v26 = vpop.f32.mrb[71].mxu0 }
 0x1cb   : > { %5468 = vst [vmem:[#allocation39_spill] sm:$0xff] %v4621_v7  ;;  %v2059_v53 = vsel %vm2057_vm1, %v2026_v27, %v2042_v28  ;;  %v2075_v58 = vsel %vm2057_vm1, %v2042_v28, %v2026_v27  ;;  %v1962_v7 = vadd.f32 %v4463_v48, %v1822_v4  ;;  %v1825_v51 = vadd.f32 %v3351_v57, %v3231_v39  ;;  %v1816_v41 = vpop.f32.mrb[7].mxu1 }
 0x1cc   : > { %5469 = vst [vmem:[#allocation40_spill] sm:$0xff] %v4625_v40  ;;  %v2096_v46 = vsel %vm2023_vm2, 0.0, %v2075_v58  ;;  %v2129_v49 = vmax.f32 %v1991_v8, %v2059_v53  ;;  %v2058_v59 = vsel %vm2057_vm1, %v2025_v34, %v2041_v22  ;;  %v2074_v40 = vsel %vm2057_vm1, %v2041_v22, %v2025_v34 }
 0x1cd   : > { %v2128_v37 = vmax.f32 %v1990_v21, %v2096_v46  ;;  %v2094_v47 = vsel %vm2023_vm2, 0.0, %v2074_v40  ;;  %v2127_v50 = vmax.f32 %v1989_v23, %v2058_v59  ;;  %v1994_v27 = vmax.f32 %v1962_v7, 0.0  ;;  %2230 = vrot.lane.b32.xlu0 %v1178_v52, %s3755_s26 }
 0x1ce   : > { %v5470_v28 = vmax.f32 %v4477_v11, 0.0  ;;  %v2126_v39 = vmax.f32 %v1988_v43, %v2094_v47  ;;  %v1960_v8 = vadd.f32 %v4463_v48, %v1814_v42  ;;  %v1963_v57 = vadd.f32 %v4463_v48, %v1825_v51  ;;  %2232 = vrot.lane.b32.xlu1 %v1181_v26, %s3755_s26 }
 0x1cf   : > { %v5471_v34 = vmax.f32 %v4482_v38, 0.0  ;;  %v2028_v22 = vrot.slane %v1994_v27, 7  ;;  %v4654_v7 = vadd.f32 %v1181_v26, %v4328_v60  ;;  %v1817_v23 = vadd.f32 %v1816_v41, %v1181_v26  ;;  %v3234_v52 = vpop.f32.mrb[72].mxu0 }
 0x1d0   : > { %v4644_v4 = vmax.f32 %v5470_v28, %v2129_v49  ;;  %v1992_v11 = vmax.f32 %v1960_v8, 0.0  ;;  %v1995_v49 = vmax.f32 %v1963_v57, 0.0  ;;  %v4657_v43 = vadd.f32 %v3234_v52, %v4330_v61  ;;  %v3354_v42 = vpop.f32.mrb[8].mxu1  ;;  %v1194_v47 = vpop.f32.mrb[73].mxu0 }
 0x1d1   : > { %v4651_v21 = vmax.f32 %v5471_v34, %v2127_v50  ;;  %v5472_v40 = vmax.f32 %v4469_v9, 0.0  ;;  %v1961_v38 = vadd.f32 %v4463_v48, %v1817_v23  ;;  %v1838_v50 = vadd.f32 %v3354_v42, %v3234_v52  ;;  %v1829_v60 = vpop.f32.mrb[9].mxu1  ;;  %2242 = vrot.lane.b32.xlu0 %v3234_v52, %s3755_s26  ;;  %v3235_v26 = vpop.f32.mrb[74].mxu0 }
 0x1d2   : > { %v4665_v58 = vadd.f32 %v1194_v47, %v4332_v62  ;;  %v5473_v41 = vmax.f32 %v4473_v6, 0.0  ;;  %v2027_v51 = vrot.slane %v1992_v11, 7  ;;  %v2044_v46 = vrot.slane %v1995_v49, 7  ;;  %2244 = vrot.lane.b32.xlu1 %v3235_v26, %s3755_s26  ;;  %v1197_v28 = vpop.f32.mrb[75].mxu0 }
 0x1d3   : > { %v4661_v53 = vmax.f32 %v5472_v40, %v2128_v37  ;;  %v1830_v59 = vadd.f32 %v1829_v60, %v1194_v47  ;;  %v4673_v9 = vadd.f32 %v3235_v26, %v4334_v63  ;;  %v3355_v37 = vpop.f32.mrb[10].mxu1  ;;  %v1993_v62 = vmax.f32 %v1961_v38, 0.0 }
 0x1d4   : > { %v4670_v61 = vmax.f32 %v5473_v41, %v2126_v39  ;;  %v1966_v8 = vadd.f32 %v4463_v48, %v1838_v50  ;;  %v1841_v57 = vadd.f32 %v3355_v37, %v3235_v26  ;;  %v4678_v34 = vadd.f32 %v1197_v28, %v4336_v0  ;;  %v1832_v6 = vpop.f32.mrb[11].mxu1 }
 0x1d5   : > { %v2061_v39 = vsel %vm2057_vm1, %v2028_v22, %v2044_v46  ;;  %v2077_v23 = vsel %vm2057_vm1, %v2044_v46, %v2028_v22  ;;  %v1964_v63 = vadd.f32 %v4463_v48, %v1830_v59  ;;  %v1833_v52 = vadd.f32 %v1832_v6, %v1197_v28  ;;  %2238 = vrot.lane.b32.xlu0 %v1194_v47, %s3755_s26 }
 0x1d6   : > { %v2100_v42 = vsel %vm2023_vm2, 0.0, %v2077_v23  ;;  %v2133_v40 = vmax.f32 %v1995_v49, %v2061_v39  ;;  %v2043_v38 = vrot.slane %v1993_v62, 7  ;;  %v1998_v50 = vmax.f32 %v1966_v8, 0.0  ;;  %2240 = vrot.lane.b32.xlu1 %v1197_v28, %s3755_s26 }
 0x1d7   : > { %v4688_v0 = vmax.f32 %v1994_v27, %v2100_v42  ;;  %v1996_v60 = vmax.f32 %v1964_v63, 0.0  ;;  %v1967_v26 = vadd.f32 %v4463_v48, %v1841_v57  ;;  %v1965_v41 = vadd.f32 %v4463_v48, %v1833_v52  ;;  %v3238_v27 = vpop.f32.mrb[76].mxu0 }
 0x1d8   : > { %v5474_v22 = vmax.f32 %v4495_v31, 0.0  ;;  %v2060_v49 = vsel %vm2057_vm1, %v2027_v51, %v2043_v38  ;;  %v2076_v59 = vsel %vm2057_vm1, %v2043_v38, %v2027_v51  ;;  %v2030_v47 = vrot.slane %v1998_v50, 7  ;;  %v3358_v39 = vpop.f32.mrb[12].mxu1  ;;  %v1210_v28 = vpop.f32.mrb[77].mxu0 }
 0x1d9   : > { %v2098_v37 = vsel %vm2023_vm2, 0.0, %v2076_v59  ;;  %v2131_v8 = vmax.f32 %v1993_v62, %v2060_v49  ;;  %v2029_v57 = vrot.slane %v1996_v60, 7  ;;  %v1999_v6 = vmax.f32 %v1967_v26, 0.0  ;;  %v1845_v42 = vpop.f32.mrb[13].mxu1  ;;  %2250 = vrot.lane.b32.xlu0 %v3238_v27, %s3755_s26  ;;  %v3239_v51 = vpop.f32.mrb[78].mxu0 }
 0x1da   : > { %v4695_v46 = vmax.f32 %v5474_v22, %v2133_v40  ;;  %v4703_v23 = vmax.f32 %v1992_v11, %v2098_v37  ;;  %v1997_v31 = vmax.f32 %v1965_v41, 0.0  ;;  %v4706_v63 = vadd.f32 %v3238_v27, %v4338_v1  ;;  %v3359_v11 = vpop.f32.mrb[14].mxu1  ;;  %2252 = vrot.lane.b32.xlu1 %v3239_v51, %s3755_s26  ;;  %v1213_v41 = vpop.f32.mrb[79].mxu0 }
 0x1db   : > { %v1854_v52 = vadd.f32 %v3358_v39, %v3238_v27  ;;  %v5476_v40 = vmax.f32 %v4499_v36, 0.0  ;;  %v2046_v62 = vrot.slane %v1999_v6, 7  ;;  %v4714_v26 = vadd.f32 %v1210_v28, %v4340_v2  ;;  %v1848_v36 = vpop.f32.mrb[15].mxu1  ;;  %v5478_v39 = vld [vmem:[#allocation13_spill] sm:$0xff] }
 0x1dc   : > { %5475 = vst [vmem:[#allocation41_spill] sm:$0xff] %v4706_v63  ;;  %v1846_v22 = vadd.f32 %v1845_v42, %v1210_v28  ;;  %v2045_v1 = vrot.slane %v1997_v31, 7  ;;  %v4721_v59 = vadd.f32 %v3239_v51, %v4342_v3  ;;  %v1857_v27 = vadd.f32 %v3359_v11, %v3239_v51 }
 0x1dd   : > { %v4711_v38 = vmax.f32 %v5476_v40, %v2131_v8  ;;  %5477 = vst [vmem:[#allocation42_spill] sm:$0xff] %v4714_v26  ;;  %v4718_v49 = vadd.f32 %v4463_v48, %v1854_v52  ;;  %v2063_v37 = vsel %vm2057_vm1, %v2030_v47, %v2046_v62  ;;  %v2079_v2 = vsel %vm2057_vm1, %v2046_v62, %v2030_v47 }
 0x1de   : > { %v4728_v8 = vadd.f32 %v4463_v48, %v1846_v22  ;;  %v4731_v42 = vadd.f32 %v1213_v41, %v5478_v39  ;;  %v2104_v52 = vsel %vm2023_vm2, 0.0, %v2079_v2  ;;  %v2137_v40 = vmax.f32 %v1999_v6, %v2063_v37  ;;  %2246 = vrot.lane.b32.xlu0 %v1210_v28, %s3755_s26  ;;  %2248 = vrot.lane.b32.xlu1 %v1213_v41, %s3755_s26 }
 0x1df   : > { %v2062_v3 = vsel %vm2057_vm1, %v2029_v57, %v2045_v1  ;;  %v2078_v51 = vsel %vm2057_vm1, %v2045_v1, %v2029_v57  ;;  %v4740_v11 = vmax.f32 %v1998_v50, %v2104_v52  ;;  %v2002_v22 = vmax.f32 %v4718_v49, 0.0  ;;  %v3242_v50 = vpop.f32.mrb[80].mxu0  ;;  %v5483_v52 = vld [vmem:[#allocation14_spill] sm:$0xff] }
 0x1e0   : > { %5479 = vst [vmem:[#allocation13_spill] sm:$0xff] %v4731_v42  ;;  %v2102_v47 = vsel %vm2023_vm2, 0.0, %v2078_v51  ;;  %v2135_v62 = vmax.f32 %v1997_v31, %v2062_v3  ;;  %v5480_v6 = vmax.f32 %v4517_v35, 0.0  ;;  %v2000_v57 = vmax.f32 %v4728_v8, 0.0 }
 0x1e1   : > { %v4750_v2 = vmax.f32 %v1996_v60, %v2102_v47  ;;  %v1971_v28 = vadd.f32 %v4463_v48, %v1857_v27  ;;  %v4756_v1 = vadd.f32 %v4458_v44, %v4463_v48  ;;  %v5481_v31 = vmax.f32 %v4521_v32, 0.0  ;;  %v1226_v60 = vpop.f32.mrb[81].mxu0  ;;  %v5485_v47 = vld [vmem:[#allocation15_spill] sm:$0xff] }
 0x1e2   : > { %v4748_v37 = vmax.f32 %v5480_v6, %v2137_v40  ;;  %v1849_v39 = vadd.f32 %v1848_v36, %v1213_v41  ;;  %v4763_v35 = vadd.f32 %v3242_v50, %v5483_v52  ;;  %v3362_v40 = vpop.f32.mrb[16].mxu1  ;;  %v2032_v3 = vrot.slane %v2002_v22, 7  ;;  %2258 = vrot.lane.b32.xlu0 %v3242_v50, %s3755_s26  ;;  %v3243_v44 = vpop.f32.mrb[82].mxu0  ;;  %v5487_v41 = vld [vmem:[#allocation16_spill] sm:$0xff] }
 0x1e3   : > { %v4760_v49 = vmax.f32 %v5481_v31, %v2135_v62  ;;  %v2003_v51 = vmax.f32 %v1971_v28, 0.0  ;;  %v1870_v8 = vadd.f32 %v3362_v40, %v3242_v50  ;;  %v4766_v27 = vadd.f32 %v1226_v60, %v5485_v47  ;;  %v1861_v6 = vpop.f32.mrb[17].mxu1  ;;  %2260 = vrot.lane.b32.xlu1 %v3243_v44, %s3755_s26  ;;  %v1229_v52 = vpop.f32.mrb[83].mxu0 }
 0x1e4   : > { %5484 = vst [vmem:[#allocation14_spill] sm:$0xff] %v4763_v35  ;;  %v2031_v26 = vrot.slane %v2000_v57, 7  ;;  %v1969_v32 = vadd.f32 %v4463_v48, %v1849_v39  ;;  %v1862_v62 = vadd.f32 %v1861_v6, %v1226_v60  ;;  %v4771_v36 = vadd.f32 %v3243_v44, %v5487_v41  ;;  %v3363_v31 = vpop.f32.mrb[18].mxu1 }
 0x1e5   : > { %5482 = vst [vmem:[#allocation43_spill] sm:$0xff] %v4760_v49  ;;  %5486 = vst [vmem:[#allocation15_spill] sm:$0xff] %v4766_v27  ;;  %v2048_v28 = vrot.slane %v2003_v51, 7  ;;  %v1974_v40 = vadd.f32 %v4463_v48, %v1870_v8  ;;  %v1873_v47 = vadd.f32 %v3363_v31, %v3243_v44  ;;  %v5489_v27 = vld [vmem:[#allocation17_spill] sm:$0xff]  ;;  %v1864_v50 = vpop.f32.mrb[19].mxu1  ;;  %v5491_v6 = vmax.f32 %v4486_v29, 0.0 }
 0x1e6   : > { %5488 = vst [vmem:[#allocation16_spill] sm:$0xff] %v4771_v36  ;;  %v4776_v35 = vadd.f32 %v1229_v52, %v5489_v27  ;;  %v2001_v42 = vmax.f32 %v1969_v32, 0.0  ;;  %v1972_v49 = vadd.f32 %v4463_v48, %v1862_v62  ;;  %v1865_v39 = vadd.f32 %v1864_v50, %v1229_v52  ;;  %2254 = vrot.lane.b32.xlu0 %v1226_v60, %s3755_s26 }
 0x1e7   : > { %v4782_v41 = vmax.f32 %v5491_v6, %v4688_v0  ;;  %v2065_v36 = vsel %vm2057_vm1, %v2032_v3, %v2048_v28  ;;  %v2081_v8 = vsel %vm2057_vm1, %v2048_v28, %v2032_v3  ;;  %v2006_v44 = vmax.f32 %v1974_v40, 0.0  ;;  %2256 = vrot.lane.b32.xlu1 %v1229_v52, %s3755_s26  ;;  %v3246_v3 = vpop.f32.mrb[84].mxu0 }
 0x1e8   : > { %5490 = vst [vmem:[#allocation17_spill] sm:$0xff] %v4776_v35  ;;  %v1975_v27 = vadd.f32 %v4463_v48, %v1873_v47  ;;  %v2108_v32 = vsel %vm2023_vm2, 0.0, %v2081_v8  ;;  %v2141_v62 = vmax.f32 %v2003_v51, %v2065_v36  ;;  %v2047_v31 = vrot.slane %v2001_v42, 7  ;;  %v3366_v36 = vpop.f32.mrb[20].mxu1  ;;  %v1242_v52 = vpop.f32.mrb[85].mxu0 }
 0x1e9   : > { %v2004_v50 = vmax.f32 %v1972_v49, 0.0  ;;  %v4793_v29 = vmax.f32 %v2002_v22, %v2108_v32  ;;  %v2034_v0 = vrot.slane %v2006_v44, 7  ;;  %v1973_v35 = vadd.f32 %v4463_v48, %v1865_v39 }
 0x1ea   : > { %v2007_v6 = vmax.f32 %v1975_v27, 0.0  ;;  %v5492_v28 = vmax.f32 %v4537_v17, 0.0  ;;  %v2064_v60 = vsel %vm2057_vm1, %v2031_v26, %v2047_v31  ;;  %v2080_v51 = vsel %vm2057_vm1, %v2047_v31, %v2031_v26  ;;  %v1877_v27 = vpop.f32.mrb[21].mxu1  ;;  %2266 = vrot.lane.b32.xlu0 %v3246_v3, %s3755_s26  ;;  %v3247_v17 = vpop.f32.mrb[86].mxu0  ;;  %v5496_v26 = vld [vmem:[#allocation19_spill] sm:$0xff] }
 0x1eb   : > { %v2033_v49 = vrot.slane %v2004_v50, 7  ;;  %v2106_v22 = vsel %vm2023_vm2, 0.0, %v2080_v51  ;;  %v2139_v47 = vmax.f32 %v2001_v42, %v2064_v60  ;;  %v2005_v39 = vmax.f32 %v1973_v35, 0.0  ;;  %v3367_v63 = vpop.f32.mrb[22].mxu1  ;;  %2268 = vrot.lane.b32.xlu1 %v3247_v17, %s3755_s26  ;;  %v1245_v51 = vpop.f32.mrb[87].mxu0 }
 0x1ec   : > { %v4798_v40 = vmax.f32 %v5492_v28, %v2141_v62  ;;  %v2050_v8 = vrot.slane %v2007_v6, 7  ;;  %v4807_v32 = vmax.f32 %v2000_v57, %v2106_v22  ;;  %v5494_v62 = vld [vmem:[#allocation18_spill] sm:$0xff]  ;;  %v4813_v31 = vadd.f32 %v1242_v52, %v5496_v26 }
 0x1ed   : > { %v4810_v28 = vadd.f32 %v3246_v3, %v5494_v62  ;;  %v5498_v42 = vmax.f32 %v4560_v5, 0.0  ;;  %v2049_v22 = vrot.slane %v2005_v39, 7  ;;  %v1880_v62 = vpop.f32.mrb[23].mxu1 }
 0x1ee   : > { %5493 = vst [vmem:[#allocation44_spill] sm:$0xff] %v4798_v40  ;;  %v1886_v40 = vadd.f32 %v3366_v36, %v3246_v3  ;;  %5497 = vst [vmem:[#allocation19_spill] sm:$0xff] %v4813_v31  ;;  %v2067_v60 = vsel %vm2057_vm1, %v2034_v0, %v2050_v8  ;;  %v2083_v57 = vsel %vm2057_vm1, %v2050_v8, %v2034_v0  ;;  %2262 = vrot.lane.b32.xlu0 %v1242_v52, %s3755_s26 }
 0x1ef   : > { %5495 = vst [vmem:[#allocation18_spill] sm:$0xff] %v4810_v28  ;;  %v4818_v35 = vmax.f32 %v5498_v42, %v2139_v47  ;;  %v2112_v3 = vsel %vm2023_vm2, 0.0, %v2083_v57  ;;  %v2145_v36 = vmax.f32 %v2007_v6, %v2067_v60  ;;  %v1878_v31 = vadd.f32 %v1877_v27, %v1242_v52  ;;  %v5499_v42 = vld [vmem:[#allocation20_spill] sm:$0xff]  ;;  %2264 = vrot.lane.b32.xlu1 %v1245_v51, %s3755_s26 }
 0x1f0   : > { %v4827_v26 = vadd.f32 %v4463_v48, %v1886_v40  ;;  %v4829_v28 = vmax.f32 %v2006_v44, %v2112_v3  ;;  %v2066_v5 = vsel %vm2057_vm1, %v2033_v49, %v2049_v22  ;;  %v2082_v47 = vsel %vm2057_vm1, %v2049_v22, %v2033_v49 }
 0x1f1   : > { %v4836_v0 = vadd.f32 %v3247_v17, %v5499_v42  ;;  %v5500_v8 = vmax.f32 %v4570_v25, 0.0  ;;  %v2110_v40 = vsel %vm2023_vm2, 0.0, %v2082_v47  ;;  %v2143_v44 = vmax.f32 %v2005_v39, %v2066_v5  ;;  %v3250_v25 = vpop.f32.mrb[88].mxu0 }
 0x1f2   : > { %v2010_v27 = vmax.f32 %v4827_v26, 0.0  ;;  %v4847_v60 = vmax.f32 %v2004_v50, %v2110_v40  ;;  %v4850_v49 = vadd.f32 %v4463_v48, %v1878_v31  ;;  %v1889_v57 = vadd.f32 %v3367_v63, %v3247_v17  ;;  %v3370_v26 = vpop.f32.mrb[24].mxu1  ;;  %v1258_v31 = vpop.f32.mrb[89].mxu0  ;;  %2274 = vrot.lane.b32.xlu0 %v3250_v25, %s3755_s26 }
 0x1f3   : > { %v4841_v6 = vmax.f32 %v5500_v8, %v2145_v36  ;;  %v4853_v52 = vadd.f32 %v1245_v51, %v4360_v12  ;;  %v4857_v22 = vadd.f32 %v4465_v10, %v4463_v48  ;;  %v5502_v39 = vmax.f32 %v4577_v54, 0.0  ;;  %v1893_v10 = vpop.f32.mrb[25].mxu1  ;;  %v3251_v54 = vpop.f32.mrb[90].mxu0 }
 0x1f4   : > { %v1881_v36 = vadd.f32 %v1880_v62, %v1245_v51  ;;  %v4864_v50 = vadd.f32 %v3250_v25, %v4362_v13  ;;  %v2008_v63 = vmax.f32 %v4850_v49, 0.0  ;;  %v1979_v12 = vadd.f32 %v4463_v48, %v1889_v57  ;;  %v3371_v42 = vpop.f32.mrb[26].mxu1  ;;  %2276 = vrot.lane.b32.xlu1 %v3251_v54, %s3755_s26  ;;  %v1261_v8 = vpop.f32.mrb[91].mxu0 }
 0x1f5   : > { %5501 = vst [vmem:[#allocation20_spill] sm:$0xff] %v4853_v52  ;;  %v4861_v3 = vmax.f32 %v5502_v39, %v2143_v44  ;;  %v1902_v17 = vadd.f32 %v3370_v26, %v3250_v25  ;;  %v4869_v5 = vadd.f32 %v1258_v31, %v4364_v14  ;;  %v1894_v13 = vadd.f32 %v1893_v10, %v1258_v31  ;;  %v1896_v57 = vpop.f32.mrb[27].mxu1 }
 0x1f6   : > { %5504 = vst [vmem:[#allocation46_spill] sm:$0xff] %v4864_v50  ;;  %v1977_v51 = vadd.f32 %v4463_v48, %v1881_v36  ;;  %v4875_v62 = vadd.f32 %v3251_v54, %v4366_v15  ;;  %v2036_v40 = vrot.slane %v2010_v27, 7  ;;  %v2011_v44 = vmax.f32 %v1979_v12, 0.0  ;;  %2270 = vrot.lane.b32.xlu0 %v1258_v31, %s3755_s26 }
 0x1f7   : > { %5503 = vst [vmem:[#allocation45_spill] sm:$0xff] %v4861_v3  ;;  %5505 = vst [vmem:[#allocation47_spill] sm:$0xff] %v4869_v5  ;;  %v1982_v14 = vadd.f32 %v4463_v48, %v1902_v17  ;;  %v1905_v49 = vadd.f32 %v3371_v42, %v3251_v54  ;;  %v4880_v39 = vadd.f32 %v4463_v48, %v1894_v13  ;;  %v2035_v15 = vrot.slane %v2008_v63, 7  ;;  %v5513_v3 = vld [vmem:[#allocation22_spill] sm:$0xff] }
 0x1f8   : > { %5506 = vst [vmem:[#allocation48_spill] sm:$0xff] %v4875_v62  ;;  %v2009_v25 = vmax.f32 %v1977_v51, 0.0  ;;  %v4883_v36 = vadd.f32 %v1261_v8, %v4368_v16  ;;  %v1897_v26 = vadd.f32 %v1896_v57, %v1261_v8  ;;  %v2052_v10 = vrot.slane %v2011_v44, 7  ;;  %2272 = vrot.lane.b32.xlu1 %v1261_v8, %s3755_s26 }
 0x1f9   : > { %v2014_v47 = vmax.f32 %v1982_v14, 0.0  ;;  %v1983_v5 = vadd.f32 %v4463_v48, %v1905_v49  ;;  %v2012_v17 = vmax.f32 %v4880_v39, 0.0  ;;  %v5508_v51 = vmax.f32 %v4490_v33, 0.0  ;;  %v3254_v49 = vpop.f32.mrb[92].mxu0 }
 0x1fa   : > { %5507 = vst [vmem:[#allocation49_spill] sm:$0xff] %v4883_v36  ;;  %v2051_v12 = vrot.slane %v2009_v25, 7  ;;  %v1981_v54 = vadd.f32 %v4463_v48, %v1897_v26  ;;  %v2069_v13 = vsel %vm2057_vm1, %v2036_v40, %v2052_v10  ;;  %v2085_v42 = vsel %vm2057_vm1, %v2052_v10, %v2036_v40  ;;  %v1274_v26 = vpop.f32.mrb[93].mxu0  ;;  %2282 = vrot.lane.b32.xlu0 %v3254_v49, %s3755_s26 }
 0x1fb   : > { %v4893_v16 = vmax.f32 %v5508_v51, %v4703_v23  ;;  %v2038_v14 = vrot.slane %v2014_v47, 7  ;;  %v2015_v31 = vmax.f32 %v1983_v5, 0.0  ;;  %v2116_v57 = vsel %vm2023_vm2, 0.0, %v2085_v42  ;;  %v3374_v23 = vpop.f32.mrb[28].mxu1  ;;  %v3255_v42 = vpop.f32.mrb[94].mxu0 }
 0x1fc   : > { %v2149_v39 = vmax.f32 %v2011_v44, %v2069_v13  ;;  %v2068_v8 = vsel %vm2057_vm1, %v2035_v15, %v2051_v12  ;;  %v2084_v33 = vsel %vm2057_vm1, %v2051_v12, %v2035_v15  ;;  %v4905_v51 = vmax.f32 %v2010_v27, %v2116_v57  ;;  %v1909_v36 = vpop.f32.mrb[29].mxu1  ;;  %2284 = vrot.lane.b32.xlu1 %v3255_v42, %s3755_s26  ;;  %v1277_v27 = vpop.f32.mrb[95].mxu0 }
 0x1fd   : > { %v2114_v40 = vsel %vm2023_vm2, 0.0, %v2084_v33  ;;  %v2147_v10 = vmax.f32 %v2009_v25, %v2068_v8  ;;  %v2037_v5 = vrot.slane %v2012_v17, 7  ;;  %v5509_v44 = vmax.f32 %v4585_v24, 0.0  ;;  %v3375_v62 = vpop.f32.mrb[30].mxu1  ;;  %v5511_v8 = vld [vmem:[#allocation21_spill] sm:$0xff] }
 0x1fe   : > { %v4914_v50 = vmax.f32 %v2008_v63, %v2114_v40  ;;  %v2054_v15 = vrot.slane %v2015_v31, 7  ;;  %v2013_v12 = vmax.f32 %v1981_v54, 0.0  ;;  %v5510_v57 = vmax.f32 %v4589_v55, 0.0  ;;  %2278 = vrot.lane.b32.xlu0 %v1274_v26, %s3755_s26 }
 0x1ff   : > { %v4912_v13 = vmax.f32 %v5509_v44, %v2149_v39  ;;  %v4922_v33 = vadd.f32 %v3254_v49, %v5511_v8  ;;  %v1918_v52 = vadd.f32 %v3374_v23, %v3254_v49  ;;  %v4925_v24 = vadd.f32 %v1274_v26, %v5513_v3  ;;  %v1912_v39 = vpop.f32.mrb[31].mxu1 }
 0x200   : > { %v4919_v25 = vmax.f32 %v5510_v57, %v2147_v10  ;;  %v2071_v63 = vsel %vm2057_vm1, %v2038_v14, %v2054_v15  ;;  %v2087_v54 = vsel %vm2057_vm1, %v2054_v15, %v2038_v14  ;;  %v2053_v40 = vrot.slane %v2013_v12, 7  ;;  %2280 = vrot.lane.b32.xlu1 %v1277_v27, %s3755_s26 }
 0x201   : > { %5512 = vst [vmem:[#allocation21_spill] sm:$0xff] %v4922_v33  ;;  %v1910_v44 = vadd.f32 %v1909_v36, %v1274_v26  ;;  %v1748_v55 = vmax.f32 %v4857_v22, 0.0  ;;  %v2120_v10 = vsel %vm2023_vm2, 0.0, %v2087_v54  ;;  %v2153_v57 = vmax.f32 %v2015_v31, %v2071_v63 }
 0x202   : > { %v4935_v49 = vadd.f32 %v3255_v42, %v4374_v19  ;;  %v2152_v3 = vmax.f32 %v2014_v47, %v2120_v10  ;;  %v2070_v23 = vsel %vm2057_vm1, %v2037_v5, %v2053_v40  ;;  %v2086_v14 = vsel %vm2057_vm1, %v2053_v40, %v2037_v5  ;;  %v5516_v10 = vld [vmem:[#allocation35_spill] sm:$0xff] }
 0x203   : > { %v1986_v36 = vadd.f32 %v4463_v48, %v1918_v52  ;;  %v5515_v22 = vmax.f32 %v4756_v1, 0.0  ;;  %v2118_v19 = vsel %vm2023_vm2, 0.0, %v2086_v14  ;;  %v2151_v31 = vmax.f32 %v2013_v12, %v2070_v23  ;;  %v5517_v14 = vld [vmem:[#allocation36_spill] sm:$0xff] }
 0x204   : > { %5514 = vst [vmem:[#allocation22_spill] sm:$0xff] %v4935_v49  ;;  %v1984_v47 = vadd.f32 %v4463_v48, %v1910_v44  ;;  %v1737_v26 = vmax.f32 %v4547_v18, 0.0  ;;  %v2150_v8 = vmax.f32 %v2012_v17, %v2118_v19  ;;  %v1921_v63 = vadd.f32 %v3375_v62, %v3255_v42  ;;  %v5518_v18 = vld [vmem:[#allocation37_spill] sm:$0xff]  ;;  %v5519_v42 = vld [vmem:[#allocation26_spill] sm:$0xff] }
 0x205   : > { %v4946_v15 = vmax.f32 %v5515_v22, %v2153_v57  ;;  %v4953_v5 = vadd.f32 %v1277_v27, %v4376_v20  ;;  %v1735_v52 = vmax.f32 %v4556_v45, 0.0  ;;  %v1741_v54 = vmax.f32 %v4596_v56, 0.0  ;;  %v5521_v56 = vld [vmem:[#allocation23_spill] sm:$0xff] }
 0x206   : > { %v4957_v1 = vmax.f32 %v1748_v55, %v2151_v31  ;;  %v1913_v40 = vadd.f32 %v1912_v39, %v1277_v27  ;;  %v1739_v57 = vmax.f32 %v5516_v10, 0.0  ;;  %v1745_v12 = vmax.f32 %v5517_v14, 0.0  ;;  %v5522_v39 = vld [vmem:[#allocation29_spill] sm:$0xff] }
 0x207   : > { %v2018_v23 = vmax.f32 %v1986_v36, 0.0  ;;  %v1987_v44 = vadd.f32 %v4463_v48, %v1921_v63  ;;  %v1743_v17 = vmax.f32 %v5518_v18, 0.0  ;;  %v2016_v62 = vmax.f32 %v1984_v47, 0.0  ;;  %v5523_v36 = vld [vmem:[#allocation27_spill] sm:$0xff]  ;;  %v5525_v47 = vld [vmem:[#allocation24_spill] sm:$0xff]  ;;  %v5526_v10 = vld [vmem:[#allocation25_spill] sm:$0xff] }
 0x208   : > { %v1985_v20 = vadd.f32 %v4463_v48, %v1913_v40  ;;  %v5520_v45 = vmax.f32 %v5519_v42, 0.0  ;;  %v1717_v27 = vadd.f32 %v5521_v56, %v4463_v48  ;;  %v1722_v55 = vadd.f32 %v5522_v39, %v4463_v48  ;;  %v5527_v42 = vld [vmem:[#allocation30_spill] sm:$0xff] }
 0x209   : > { %v2019_v19 = vmax.f32 %v1987_v44, 0.0  ;;  %v5524_v31 = vmax.f32 %v5523_v36, 0.0  ;;  %v1715_v40 = vadd.f32 %v5525_v47, %v4463_v48  ;;  %v1721_v14 = vadd.f32 %v5526_v10, %v4463_v48 }
 0x20a   : > { %v4967_v22 = vmax.f32 %v5520_v45, %v4740_v11  ;;  %v2017_v11 = vmax.f32 %v1985_v20, 0.0  ;;  %v4983_v18 = vmax.f32 %v1737_v26, %v4793_v29  ;;  %v1720_v45 = vadd.f32 %v5527_v42, %v4463_v48 }
 0x20b   : > { %v4976_v63 = vmax.f32 %v5524_v31, %v4750_v2  ;;  %v2040_v56 = vrot.slane %v2018_v23, 7  ;;  %v2056_v44 = vrot.slane %v2019_v19, 7  ;;  %v4988_v39 = vmax.f32 %v1735_v52, %v4807_v32  ;;  %v5528_v2 = vld [vmem:[#allocation28_spill] sm:$0xff] }
 0x20c   : > { %v1719_v36 = vadd.f32 %v5528_v2, %v4463_v48  ;;  %v2039_v31 = vrot.slane %v2016_v62, 7  ;;  %v2055_v47 = vrot.slane %v2017_v11, 7  ;;  %v4993_v33 = vmax.f32 %v1741_v54, %v4829_v28 }
 0x20d   : > { %v1754_v20 = vmax.f32 %v1722_v55, 0.0  ;;  %v2073_v29 = vsel %vm2057_vm1, %v2040_v56, %v2056_v44  ;;  %v2089_v26 = vsel %vm2057_vm1, %v2056_v44, %v2040_v56  ;;  %v5000_v10 = vmax.f32 %v1739_v57, %v4847_v60 }
 0x20e   : > { %v2124_v32 = vsel %vm2023_vm2, 0.0, %v2089_v26  ;;  %v2157_v52 = vmax.f32 %v2019_v19, %v2073_v29  ;;  %v2072_v48 = vsel %vm2057_vm1, %v2039_v31, %v2055_v47  ;;  %v2088_v28 = vsel %vm2057_vm1, %v2055_v47, %v2039_v31 }
 0x20f   : > { %v1752_v54 = vmax.f32 %v1720_v45, 0.0  ;;  %v2156_v55 = vmax.f32 %v2018_v23, %v2124_v32  ;;  %v2122_v42 = vsel %vm2023_vm2, 0.0, %v2088_v28  ;;  %v2155_v2 = vmax.f32 %v2017_v11, %v2072_v48 }
 0x210   : > { %v1749_v56 = vmax.f32 %v1717_v27, 0.0  ;;  %v5010_v44 = vmax.f32 %v1754_v20, %v2157_v52  ;;  %v2154_v60 = vmax.f32 %v2016_v62, %v2122_v42  ;;  %v5013_v57 = vmax.f32 %v1745_v12, %v4905_v51  ;;  %v5028_v62 = vpop.permute.xlu0 %2451 }
 0x211   : > { %v1747_v19 = vmax.f32 %v1715_v40, 0.0  ;;  %v1751_v29 = vmax.f32 %v1719_v36, 0.0  ;;  %v5015_v26 = vmax.f32 %v1752_v54, %v2155_v2  ;;  %v5018_v49 = vmax.f32 %v1743_v17, %v4914_v50 }
 0x212   : > { %v1753_v45 = vmax.f32 %v1721_v14, 0.0  ;;  %v5020_v23 = vmax.f32 %v1749_v56, %v2152_v3 }
 0x213   : > { %v5022_v31 = vmax.f32 %v1747_v19, %v2150_v8  ;;  %v5024_v11 = vmax.f32 %v1751_v29, %v2154_v60 }
 0x214   : > { %v5026_v27 = vmax.f32 %v1753_v45, %v2156_v55 }
 0x232   : > { %v2227_v51 = vpop.permute.xlu1 %2226 }
 0x233   : > { %v2223_v12 = vpop.permute.xlu0 %2222  ;;  %v2319_v36 = vrot.slane %v2227_v51, 7 }
 0x234   : > { %v2318_v50 = vrot.slane %v2223_v12, 7 }
 0x236   : > { %v2229_v40 = vpop.permute.xlu1 %2228 }
 0x237   : > { %v2335_v47 = vrot.slane %v2229_v40, 7  ;;  %v2225_v20 = vpop.permute.xlu0 %2224 }
 0x238   : > { %v2334_v32 = vrot.slane %v2225_v20, 7 }
 0x239   : > { %v2351_v3 = vsel %vm2057_vm1, %v2319_v36, %v2335_v47  ;;  %v2367_v8 = vsel %vm2057_vm1, %v2335_v47, %v2319_v36 }
 0x23a   : > { %2524 = vrot.lane.b32.xlu0 %v2351_v3, %s3754_s19  ;;  %v2384_v17 = vsel %vm2023_vm2, 0.0, %v2367_v8  ;;  %v2366_v52 = vsel %vm2057_vm1, %v2334_v32, %v2318_v50  ;;  %v2350_v55 = vsel %vm2057_vm1, %v2318_v50, %v2334_v32 }
 0x23b   : > { %v2235_v14 = vpop.permute.xlu0 %2234  ;;  %2522 = vrot.lane.b32.xlu1 %v2384_v17, %s3754_s19  ;;  %v2382_v42 = vsel %vm2023_vm2, 0.0, %v2366_v52 }
 0x23c   : > { %v2321_v48 = vrot.slane %v2235_v14, 7  ;;  %v2237_v28 = vpop.permute.xlu1 %2236 }
 0x23d   : > { %v2337_v54 = vrot.slane %v2237_v28, 7 }
 0x23e   : > { %2520 = vrot.lane.b32.xlu0 %v2350_v55, %s3754_s19 }
 0x23f   : > { %v2231_v2 = vpop.permute.xlu0 %2230  ;;  %2518 = vrot.lane.b32.xlu1 %v2382_v42, %s3754_s19  ;;  %v2369_v56 = vsel %vm2057_vm1, %v2337_v54, %v2321_v48  ;;  %v2353_v45 = vsel %vm2057_vm1, %v2321_v48, %v2337_v54 }
 0x240   : > { %v2320_v60 = vrot.slane %v2231_v2, 7  ;;  %v2233_v19 = vpop.permute.xlu1 %2232  ;;  %v2388_v51 = vsel %vm2023_vm2, 0.0, %v2369_v56 }
 0x241   : > { %v2336_v29 = vrot.slane %v2233_v19, 7 }
 0x242   : > { %2532 = vrot.lane.b32.xlu0 %v2353_v45, %s3754_s19 }
 0x243   : > { %v2243_v12 = vpop.permute.xlu0 %2242  ;;  %2530 = vrot.lane.b32.xlu1 %v2388_v51, %s3754_s19  ;;  %v2368_v40 = vsel %vm2057_vm1, %v2336_v29, %v2320_v60  ;;  %v2352_v32 = vsel %vm2057_vm1, %v2320_v60, %v2336_v29 }
 0x244   : > { %v2323_v36 = vrot.slane %v2243_v12, 7  ;;  %v2245_v47 = vpop.permute.xlu1 %2244  ;;  %v2386_v50 = vsel %vm2023_vm2, 0.0, %v2368_v40 }
 0x245   : > { %v2339_v20 = vrot.slane %v2245_v47, 7 }
 0x246   : > { %2528 = vrot.lane.b32.xlu0 %v2352_v32, %s3754_s19 }
 0x247   : > { %v2239_v3 = vpop.permute.xlu0 %2238  ;;  %2526 = vrot.lane.b32.xlu1 %v2386_v50, %s3754_s19  ;;  %v2371_v8 = vsel %vm2057_vm1, %v2339_v20, %v2323_v36  ;;  %v2355_v48 = vsel %vm2057_vm1, %v2323_v36, %v2339_v20 }
 0x248   : > { %v2322_v17 = vrot.slane %v2239_v3, 7  ;;  %v2241_v14 = vpop.permute.xlu1 %2240  ;;  %v2392_v28 = vsel %vm2023_vm2, 0.0, %v2371_v8 }
 0x249   : > { %v2338_v52 = vrot.slane %v2241_v14, 7 }
 0x24a   : > { %2540 = vrot.lane.b32.xlu0 %v2355_v48, %s3754_s19 }
 0x24b   : > { %v2251_v54 = vpop.permute.xlu0 %2250  ;;  %2538 = vrot.lane.b32.xlu1 %v2392_v28, %s3754_s19  ;;  %v2370_v55 = vsel %vm2057_vm1, %v2338_v52, %v2322_v17  ;;  %v2354_v60 = vsel %vm2057_vm1, %v2322_v17, %v2338_v52 }
 0x24c   : > { %v2325_v42 = vrot.slane %v2251_v54, 7  ;;  %v2253_v2 = vpop.permute.xlu1 %2252  ;;  %v2390_v19 = vsel %vm2023_vm2, 0.0, %v2370_v55 }
 0x24d   : > { %v2341_v56 = vrot.slane %v2253_v2, 7 }
 0x24e   : > { %2536 = vrot.lane.b32.xlu0 %v2354_v60, %s3754_s19 }
 0x24f   : > { %2534 = vrot.lane.b32.xlu1 %v2390_v19, %s3754_s19  ;;  %v2373_v45 = vsel %vm2057_vm1, %v2341_v56, %v2325_v42  ;;  %v2357_v36 = vsel %vm2057_vm1, %v2325_v42, %v2341_v56 }
 0x250   : > { %v2247_v29 = vpop.permute.xlu0 %2246  ;;  %v2249_v12 = vpop.permute.xlu1 %2248  ;;  %v2396_v47 = vsel %vm2023_vm2, 0.0, %v2373_v45 }
 0x251   : > { %v2324_v51 = vrot.slane %v2247_v29, 7  ;;  %v2340_v40 = vrot.slane %v2249_v12, 7 }
 0x252   : > { %2548 = vrot.lane.b32.xlu0 %v2357_v36, %s3754_s19 }
 0x253   : > { %2546 = vrot.lane.b32.xlu1 %v2396_v47, %s3754_s19  ;;  %v2372_v32 = vsel %vm2057_vm1, %v2340_v40, %v2324_v51  ;;  %v2356_v17 = vsel %vm2057_vm1, %v2324_v51, %v2340_v40 }
 0x254   : > { %v2259_v20 = vpop.permute.xlu0 %2258  ;;  %v2394_v14 = vsel %vm2023_vm2, 0.0, %v2372_v32 }
 0x255   : > { %v2327_v50 = vrot.slane %v2259_v20, 7  ;;  %v2261_v3 = vpop.permute.xlu1 %2260 }
 0x256   : > { %v2343_v8 = vrot.slane %v2261_v3, 7  ;;  %2544 = vrot.lane.b32.xlu0 %v2356_v17, %s3754_s19 }
 0x257   : > { %2542 = vrot.lane.b32.xlu1 %v2394_v14, %s3754_s19 }
 0x258   : > { %v2255_v52 = vpop.permute.xlu0 %2254  ;;  %v2375_v48 = vsel %vm2057_vm1, %v2343_v8, %v2327_v50  ;;  %v2359_v42 = vsel %vm2057_vm1, %v2327_v50, %v2343_v8 }
 0x259   : > { %v2326_v28 = vrot.slane %v2255_v52, 7  ;;  %v2257_v54 = vpop.permute.xlu1 %2256  ;;  %v2400_v2 = vsel %vm2023_vm2, 0.0, %v2375_v48 }
 0x25a   : > { %v2342_v55 = vrot.slane %v2257_v54, 7  ;;  %2556 = vrot.lane.b32.xlu0 %v2359_v42, %s3754_s19 }
 0x25b   : > { %2554 = vrot.lane.b32.xlu1 %v2400_v2, %s3754_s19 }
 0x25c   : > { %v2267_v56 = vpop.permute.xlu0 %2266  ;;  %v2374_v60 = vsel %vm2057_vm1, %v2342_v55, %v2326_v28  ;;  %v2358_v51 = vsel %vm2057_vm1, %v2326_v28, %v2342_v55 }
 0x25d   : > { %v2329_v19 = vrot.slane %v2267_v56, 7  ;;  %v2269_v29 = vpop.permute.xlu1 %2268  ;;  %v2398_v12 = vsel %vm2023_vm2, 0.0, %v2374_v60 }
 0x25e   : > { %v2345_v45 = vrot.slane %v2269_v29, 7  ;;  %2552 = vrot.lane.b32.xlu0 %v2358_v51, %s3754_s19 }
 0x25f   : > { %2550 = vrot.lane.b32.xlu1 %v2398_v12, %s3754_s19 }
 0x260   : > { %v2263_v40 = vpop.permute.xlu0 %2262  ;;  %v2377_v36 = vsel %vm2057_vm1, %v2345_v45, %v2329_v19  ;;  %v2361_v50 = vsel %vm2057_vm1, %v2329_v19, %v2345_v45 }
 0x261   : > { %v2328_v47 = vrot.slane %v2263_v40, 7  ;;  %v2265_v20 = vpop.permute.xlu1 %2264  ;;  %v2404_v3 = vsel %vm2023_vm2, 0.0, %v2377_v36 }
 0x262   : > { %v2344_v32 = vrot.slane %v2265_v20, 7  ;;  %2564 = vrot.lane.b32.xlu0 %v2361_v50, %s3754_s19 }
 0x263   : > { %2562 = vrot.lane.b32.xlu1 %v2404_v3, %s3754_s19 }
 0x264   : > { %v2275_v8 = vpop.permute.xlu0 %2274  ;;  %v2376_v17 = vsel %vm2057_vm1, %v2344_v32, %v2328_v47  ;;  %v2360_v28 = vsel %vm2057_vm1, %v2328_v47, %v2344_v32 }
 0x265   : > { %v2331_v14 = vrot.slane %v2275_v8, 7  ;;  %v2402_v54 = vsel %vm2023_vm2, 0.0, %v2376_v17 }
 0x266   : > { %v2277_v52 = vpop.permute.xlu1 %2276  ;;  %2560 = vrot.lane.b32.xlu0 %v2360_v28, %s3754_s19 }
 0x267   : > { %v2347_v48 = vrot.slane %v2277_v52, 7  ;;  %2558 = vrot.lane.b32.xlu1 %v2402_v54, %s3754_s19 }
 0x268   : > { %v2271_v55 = vpop.permute.xlu0 %2270 }
 0x269   : > { %v2379_v42 = vsel %vm2057_vm1, %v2347_v48, %v2331_v14  ;;  %v2330_v2 = vrot.slane %v2271_v55, 7  ;;  %v2363_v19 = vsel %vm2057_vm1, %v2331_v14, %v2347_v48  ;;  %v5529_v55 = vld [vmem:[#allocation33_spill] sm:$0xff] }
 0x26a   : > { %v2273_v56 = vpop.permute.xlu1 %2272  ;;  %2572 = vrot.lane.b32.xlu0 %v2363_v19, %s3754_s19  ;;  %v2408_v29 = vsel %vm2023_vm2, 0.0, %v2379_v42  ;;  %v2457_v42 = vadd.f32 %v5028_v62, %v5529_v55 }
 0x26b   : > { %v2346_v60 = vrot.slane %v2273_v56, 7  ;;  %2570 = vrot.lane.b32.xlu1 %v2408_v29, %s3754_s19  ;;  %v5530_v56 = vld [vmem:[#allocation31_spill] sm:$0xff] }
 0x26c   : > { %v2283_v45 = vpop.permute.xlu0 %2282 }
 0x26d   : > { %v2378_v51 = vsel %vm2057_vm1, %v2346_v60, %v2330_v2  ;;  %v2362_v40 = vsel %vm2057_vm1, %v2330_v2, %v2346_v60  ;;  %v2333_v50 = vrot.slane %v2283_v45, 7  ;;  %v2456_v60 = vadd.f32 %v5028_v62, %v5530_v56 }
 0x26e   : > { %v2285_v12 = vpop.permute.xlu1 %2284  ;;  %2568 = vrot.lane.b32.xlu0 %v2362_v40, %s3754_s19  ;;  %v2406_v36 = vsel %vm2023_vm2, 0.0, %v2378_v51 }
 0x26f   : > { %2566 = vrot.lane.b32.xlu1 %v2406_v36, %s3754_s19  ;;  %v2349_v3 = vrot.slane %v2285_v12, 7  ;;  %v5531_v12 = vld [vmem:[#allocation34_spill] sm:$0xff] }
 0x270   : > { %v2279_v47 = vpop.permute.xlu0 %2278  ;;  %v2455_v40 = vadd.f32 %v5028_v62, %v5531_v12  ;;  %v5535_v12 = vld [vmem:[#allocation39_spill] sm:$0xff] }
 0x271   : > { %v2332_v20 = vrot.slane %v2279_v47, 7  ;;  %v2381_v48 = vsel %vm2057_vm1, %v2349_v3, %v2333_v50  ;;  %v2365_v28 = vsel %vm2057_vm1, %v2333_v50, %v2349_v3  ;;  %v5532_v47 = vld [vmem:[#allocation32_spill] sm:$0xff] }
 0x272   : > { %v2281_v32 = vpop.permute.xlu1 %2280  ;;  %v2412_v54 = vsel %vm2023_vm2, 0.0, %v2381_v48 }
 0x273   : > { %v2348_v8 = vrot.slane %v2281_v32, 7 }
 0x275   : > { %v2364_v17 = vsel %vm2057_vm1, %v2332_v20, %v2348_v8  ;;  %v2380_v14 = vsel %vm2057_vm1, %v2348_v8, %v2332_v20  ;;  %v2454_v20 = vadd.f32 %v5028_v62, %v5532_v47 }
 0x276   : > { %2576 = vrot.lane.b32.xlu0 %v2364_v17, %s3754_s19  ;;  %v2410_v52 = vsel %vm2023_vm2, 0.0, %v2380_v14 }
 0x277   : > { %2574 = vrot.lane.b32.xlu1 %v2410_v52, %s3754_s19  ;;  %v5533_v52 = vld [vmem:[#allocation40_spill] sm:$0xff] }
 0x27a   : > { %2580 = vrot.lane.b32.xlu0 %v2365_v28, %s3754_s19 }
 0x27b   : > { %2578 = vrot.lane.b32.xlu1 %v2412_v54, %s3754_s19  ;;  %v5534_v54 = vld [vmem:[#allocation38_spill] sm:$0xff] }
 0x27c   : > { %v2460_v55 = vadd.f32 %v5028_v62, %v5534_v54 }
 0x2ac   : > { %v2525_v2 = vpop.permute.xlu0 %2524 }
 0x2ad   : > { %v2617_v19 = vadd.f32 %v2525_v2, %v2457_v42  ;;  %v2523_v29 = vpop.permute.xlu1 %2522 }
 0x2ae   : > { %v2616_v45 = vadd.f32 %v2523_v29, %v2456_v60  ;;  %v2459_v29 = vadd.f32 %v5028_v62, %v4654_v7 }
 0x2af   : > { %v2649_v51 = vmax.f32 %v2617_v19, 0.0 }
 0x2b0   : > { %v2648_v30 = vmax.f32 %v2616_v45, 0.0  ;;  %v2521_v36 = vpop.permute.xlu0 %2520 }
 0x2b1   : > { %v2682_v32 = vsel %vm2678_vm3, %v4644_v4, %v2649_v51  ;;  %v2615_v50 = vadd.f32 %v2521_v36, %v2455_v40  ;;  %v2519_v3 = vpop.permute.xlu1 %2518  ;;  %v2461_v4 = vadd.f32 %v5028_v62, %v5533_v52  ;;  %v2463_v52 = vadd.f32 %v5028_v62, %v4678_v34 }
 0x2b2   : > { %2714 = vst.msk [vmem:[%s5169_s21 + $0x18] sm:$0xff] %vm529_vm0, %v2682_v32  ;;  %v2681_v8 = vsel %vm2678_vm3, %v4661_v53, %v2648_v30  ;;  %v2614_v17 = vadd.f32 %v2519_v3, %v2454_v20  ;;  %v2465_v20 = vadd.f32 %v5028_v62, %v4673_v9 }
 0x2b3   : > { %2713 = vst.msk [vmem:[%s5169_s21 + $0x10] sm:$0xff] %vm529_vm0, %v2681_v8  ;;  %v2647_v14 = vmax.f32 %v2615_v50, 0.0 }
 0x2b4   : > { %v2646_v48 = vmax.f32 %v2614_v17, 0.0  ;;  %v2533_v28 = vpop.permute.xlu0 %2532 }
 0x2b5   : > { %v2680_v42 = vsel %vm2678_vm3, %v4651_v21, %v2647_v14  ;;  %v2621_v2 = vadd.f32 %v2533_v28, %v2461_v4  ;;  %v2531_v56 = vpop.permute.xlu1 %2530  ;;  %v2458_v21 = vadd.f32 %v5028_v62, %v5535_v12 }
 0x2b6   : > { %2712 = vst.msk [vmem:[%s5169_s21 + $0x8] sm:$0xff] %vm529_vm0, %v2680_v42  ;;  %v2679_v53 = vsel %vm2678_vm3, %v4670_v61, %v2646_v48  ;;  %v2620_v60 = vadd.f32 %v2531_v56, %v2460_v55  ;;  %v2469_v42 = vadd.f32 %v5028_v62, %v4721_v59  ;;  %v5536_v56 = vld [vmem:[#allocation41_spill] sm:$0xff] }
 0x2b7   : > { %2711 = vst.msk [vmem:[%s5169_s21] sm:$0xff] %vm529_vm0, %v2679_v53  ;;  %v2653_v19 = vmax.f32 %v2621_v2, 0.0  ;;  %v5537_v53 = vld [vmem:[#allocation43_spill] sm:$0xff] }
 0x2b8   : > { %v2652_v45 = vmax.f32 %v2620_v60, 0.0  ;;  %v2529_v51 = vpop.permute.xlu0 %2528 }
 0x2b9   : > { %v2686_v40 = vsel %vm2678_vm3, %v4695_v46, %v2653_v19  ;;  %v2619_v30 = vadd.f32 %v2529_v51, %v2459_v29  ;;  %v2527_v36 = vpop.permute.xlu1 %2526  ;;  %v2464_v46 = vadd.f32 %v5028_v62, %v4657_v43  ;;  %v5538_v51 = vld [vmem:[#allocation13_spill] sm:$0xff] }
 0x2ba   : > { %2718 = vst.msk [vmem:[%s5169_s21 + $0x38] sm:$0xff] %vm529_vm0, %v2686_v40  ;;  %v2685_v61 = vsel %vm2678_vm3, %v4782_v41, %v2652_v45  ;;  %v2618_v47 = vadd.f32 %v2527_v36, %v2458_v21  ;;  %v2467_v12 = vadd.f32 %v5028_v62, %v5538_v51 }
 0x2bb   : > { %2717 = vst.msk [vmem:[%s5169_s21 + $0x30] sm:$0xff] %vm529_vm0, %v2685_v61  ;;  %v2651_v7 = vmax.f32 %v2619_v30, 0.0  ;;  %v5539_v30 = vld [vmem:[#allocation42_spill] sm:$0xff]  ;;  %v5540_v61 = vld [vmem:[#allocation44_spill] sm:$0xff] }
 0x2bc   : > { %v2650_v32 = vmax.f32 %v2618_v47, 0.0  ;;  %v2541_v50 = vpop.permute.xlu0 %2540  ;;  %v2466_v36 = vadd.f32 %v5028_v62, %v5539_v30 }
 0x2bd   : > { %v2684_v3 = vsel %vm2678_vm3, %v4711_v38, %v2651_v7  ;;  %v2625_v8 = vadd.f32 %v2541_v50, %v2465_v20  ;;  %v2539_v17 = vpop.permute.xlu1 %2538  ;;  %v2462_v38 = vadd.f32 %v5028_v62, %v4665_v58 }
 0x2be   : > { %2716 = vst.msk [vmem:[%s5169_s21 + $0x28] sm:$0xff] %vm529_vm0, %v2684_v3  ;;  %v2683_v41 = vsel %vm2678_vm3, %v4893_v16, %v2650_v32  ;;  %v2624_v14 = vadd.f32 %v2539_v17, %v2464_v46  ;;  %v5541_v46 = vld [vmem:[#allocation16_spill] sm:$0xff] }
 0x2bf   : > { %2715 = vst.msk [vmem:[%s5169_s21 + $0x20] sm:$0xff] %vm529_vm0, %v2683_v41  ;;  %v2657_v9 = vmax.f32 %v2625_v8, 0.0  ;;  %v2473_v3 = vadd.f32 %v5028_v62, %v5541_v46  ;;  %v5542_v41 = vld [vmem:[#allocation14_spill] sm:$0xff] }
 0x2c0   : > { %v2656_v43 = vmax.f32 %v2624_v14, 0.0  ;;  %v2537_v4 = vpop.permute.xlu0 %2536  ;;  %v2472_v14 = vadd.f32 %v5028_v62, %v5542_v41 }
 0x2c1   : > { %v2690_v48 = vsel %vm2678_vm3, %v4748_v37, %v2657_v9  ;;  %v2623_v28 = vadd.f32 %v2537_v4, %v2463_v52  ;;  %v2535_v54 = vpop.permute.xlu1 %2534  ;;  %v2468_v37 = vadd.f32 %v5028_v62, %v5536_v56 }
 0x2c2   : > { %2722 = vst.msk [vmem:[%s5169_s21 + $0x58] sm:$0xff] %vm529_vm0, %v2690_v48  ;;  %v2689_v16 = vsel %vm2678_vm3, %v4967_v22, %v2656_v43  ;;  %v2622_v55 = vadd.f32 %v2535_v54, %v2462_v38  ;;  %v5543_v48 = vld [vmem:[#allocation17_spill] sm:$0xff] }
 0x2c3   : > { %2721 = vst.msk [vmem:[%s5169_s21 + $0x50] sm:$0xff] %vm529_vm0, %v2689_v16  ;;  %v2655_v34 = vmax.f32 %v2623_v28, 0.0  ;;  %v2471_v28 = vadd.f32 %v5028_v62, %v5543_v48 }
 0x2c4   : > { %v2654_v58 = vmax.f32 %v2622_v55, 0.0  ;;  %v2549_v2 = vpop.permute.xlu0 %2548  ;;  %v5544_v55 = vld [vmem:[#allocation15_spill] sm:$0xff] }
 0x2c5   : > { %v2688_v60 = vsel %vm2678_vm3, %v5537_v53, %v2655_v34  ;;  %v2629_v19 = vadd.f32 %v2549_v2, %v2469_v42  ;;  %v2547_v29 = vpop.permute.xlu1 %2546 }
 0x2c6   : > { %2720 = vst.msk [vmem:[%s5169_s21 + $0x48] sm:$0xff] %vm529_vm0, %v2688_v60  ;;  %v2687_v22 = vsel %vm2678_vm3, %v4976_v63, %v2654_v58  ;;  %v2628_v45 = vadd.f32 %v2547_v29, %v2468_v37  ;;  %v2477_v37 = vadd.f32 %v5028_v62, %v4836_v0  ;;  %v5546_v29 = vld [vmem:[#allocation45_spill] sm:$0xff] }
 0x2c7   : > { %2719 = vst.msk [vmem:[%s5169_s21 + $0x40] sm:$0xff] %vm529_vm0, %v2687_v22  ;;  %v2661_v59 = vmax.f32 %v2629_v19, 0.0  ;;  %v5545_v19 = vld [vmem:[#allocation18_spill] sm:$0xff] }
 0x2c8   : > { %v2660_v21 = vmax.f32 %v2628_v45, 0.0  ;;  %v2545_v40 = vpop.permute.xlu0 %2544 }
 0x2c9   : > { %v2694_v47 = vsel %vm2678_vm3, %v5540_v61, %v2661_v59  ;;  %v2627_v7 = vadd.f32 %v2545_v40, %v2467_v12  ;;  %v2543_v20 = vpop.permute.xlu1 %2542  ;;  %v5547_v12 = vld [vmem:[#allocation20_spill] sm:$0xff] }
 0x2ca   : > { %2726 = vst.msk [vmem:[%s5169_s21 + $0x78] sm:$0xff] %vm529_vm0, %v2694_v47  ;;  %v2693_v63 = vsel %vm2678_vm3, %v4983_v18, %v2660_v21  ;;  %v2626_v32 = vadd.f32 %v2543_v20, %v2466_v36  ;;  %v2475_v21 = vadd.f32 %v5028_v62, %v5547_v12  ;;  %v5548_v36 = vld [vmem:[#allocation19_spill] sm:$0xff] }
 0x2cb   : > { %2725 = vst.msk [vmem:[%s5169_s21 + $0x70] sm:$0xff] %vm529_vm0, %v2693_v63  ;;  %v2659_v50 = vmax.f32 %v2627_v7, 0.0  ;;  %v2474_v61 = vadd.f32 %v5028_v62, %v5548_v36 }
 0x2cc   : > { %v2658_v8 = vmax.f32 %v2626_v32, 0.0  ;;  %v2557_v17 = vpop.permute.xlu0 %2556 }
 0x2cd   : > { %v2692_v9 = vsel %vm2678_vm3, %v4818_v35, %v2659_v50  ;;  %v2633_v52 = vadd.f32 %v2557_v17, %v2473_v3  ;;  %v2555_v43 = vpop.permute.xlu1 %2554  ;;  %v2470_v35 = vadd.f32 %v5028_v62, %v5544_v55  ;;  %v5549_v50 = vld [vmem:[#allocation48_spill] sm:$0xff]  ;;  %v5550_v17 = vld [vmem:[#allocation46_spill] sm:$0xff] }
 0x2ce   : > { %2724 = vst.msk [vmem:[%s5169_s21 + $0x68] sm:$0xff] %vm529_vm0, %v2692_v9  ;;  %v2691_v18 = vsel %vm2678_vm3, %v4988_v39, %v2658_v8  ;;  %v2632_v4 = vadd.f32 %v2555_v43, %v2472_v14  ;;  %v2481_v46 = vadd.f32 %v5028_v62, %v5549_v50 }
 0x2cf   : > { %2723 = vst.msk [vmem:[%s5169_s21 + $0x60] sm:$0xff] %vm529_vm0, %v2691_v18  ;;  %v2665_v38 = vmax.f32 %v2633_v52, 0.0  ;;  %v5551_v18 = vld [vmem:[#allocation49_spill] sm:$0xff] }
 0x2d0   : > { %v2664_v54 = vmax.f32 %v2632_v4, 0.0  ;;  %v2553_v16 = vpop.permute.xlu0 %2552  ;;  %v2479_v4 = vadd.f32 %v5028_v62, %v5551_v18 }
 0x2d1   : > { %v2698_v34 = vsel %vm2678_vm3, %v4841_v6, %v2665_v38  ;;  %v2631_v42 = vadd.f32 %v2553_v16, %v2471_v28  ;;  %v2551_v58 = vpop.permute.xlu1 %2550  ;;  %v2476_v6 = vadd.f32 %v5028_v62, %v5545_v19  ;;  %v5552_v28 = vld [vmem:[#allocation47_spill] sm:$0xff] }
 0x2d2   : > { %2730 = vst.msk [vmem:[%s5169_s21 + $0x98] sm:$0xff] %vm529_vm0, %v2698_v34  ;;  %v2697_v39 = vsel %vm2678_vm3, %v4993_v33, %v2664_v54  ;;  %v2630_v2 = vadd.f32 %v2551_v58, %v2470_v35 }
 0x2d3   : > { %2729 = vst.msk [vmem:[%s5169_s21 + $0x90] sm:$0xff] %vm529_vm0, %v2697_v39  ;;  %v2663_v56 = vmax.f32 %v2631_v42, 0.0  ;;  %v2483_v39 = vadd.f32 %v5028_v62, %v4953_v5  ;;  %v5553_v5 = vld [vmem:[#allocation22_spill] sm:$0xff] }
 0x2d4   : > { %v2662_v53 = vmax.f32 %v2630_v2, 0.0  ;;  %v2565_v60 = vpop.permute.xlu0 %2564 }
 0x2d5   : > { %v2696_v22 = vsel %vm2678_vm3, %v5546_v29, %v2663_v56  ;;  %v2637_v45 = vadd.f32 %v2565_v60, %v2477_v37  ;;  %v2563_v59 = vpop.permute.xlu1 %2562  ;;  %v2485_v60 = vadd.f32 %v5028_v62, %v5553_v5  ;;  %v5554_v29 = vld [vmem:[#allocation21_spill] sm:$0xff] }
 0x2d6   : > { %2728 = vst.msk [vmem:[%s5169_s21 + $0x88] sm:$0xff] %vm529_vm0, %v2696_v22  ;;  %v2695_v33 = vsel %vm2678_vm3, %v5000_v10, %v2662_v53  ;;  %v2636_v51 = vadd.f32 %v2563_v59, %v2476_v6 }
 0x2d7   : > { %2727 = vst.msk [vmem:[%s5169_s21 + $0x80] sm:$0xff] %vm529_vm0, %v2695_v33  ;;  %v2669_v0 = vmax.f32 %v2637_v45, 0.0 }
 0x2d8   : > { %v2668_v40 = vmax.f32 %v2636_v51, 0.0  ;;  %v2561_v30 = vpop.permute.xlu0 %2560 }
 0x2d9   : > { %v2702_v47 = vsel %vm2678_vm3, %v4912_v13, %v2669_v0  ;;  %v2635_v7 = vadd.f32 %v2561_v30, %v2475_v21  ;;  %v2559_v20 = vpop.permute.xlu1 %2558  ;;  %v2480_v13 = vadd.f32 %v5028_v62, %v5550_v17 }
 0x2da   : > { %2734 = vst.msk [vmem:[%s5169_s21 + $0xb8] sm:$0xff] %vm529_vm0, %v2702_v47  ;;  %v2701_v10 = vsel %vm2678_vm3, %v5013_v57, %v2668_v40  ;;  %v2634_v63 = vadd.f32 %v2559_v20, %v2474_v61 }
 0x2db   : > { %2733 = vst.msk [vmem:[%s5169_s21 + $0xb0] sm:$0xff] %vm529_vm0, %v2701_v10  ;;  %v2667_v32 = vmax.f32 %v2635_v7, 0.0 }
 0x2dc   : > { %v2666_v3 = vmax.f32 %v2634_v63, 0.0  ;;  %v2573_v8 = vpop.permute.xlu0 %2572 }
 0x2dd   : > { %v2700_v41 = vsel %vm2678_vm3, %v4919_v25, %v2667_v32  ;;  %v2641_v14 = vadd.f32 %v2573_v8, %v2481_v46  ;;  %v2571_v9 = vpop.permute.xlu1 %2570  ;;  %v2478_v25 = vadd.f32 %v5028_v62, %v5552_v28 }
 0x2de   : > { %2732 = vst.msk [vmem:[%s5169_s21 + $0xa8] sm:$0xff] %vm529_vm0, %v2700_v41  ;;  %v2699_v57 = vsel %vm2678_vm3, %v5018_v49, %v2666_v3  ;;  %v2640_v52 = vadd.f32 %v2571_v9, %v2480_v13 }
 0x2df   : > { %2731 = vst.msk [vmem:[%s5169_s21 + $0xa0] sm:$0xff] %vm529_vm0, %v2699_v57  ;;  %v2673_v43 = vmax.f32 %v2641_v14, 0.0 }
 0x2e0   : > { %v2672_v38 = vmax.f32 %v2640_v52, 0.0  ;;  %v2569_v48 = vpop.permute.xlu0 %2568 }
 0x2e1   : > { %v2706_v54 = vsel %vm2678_vm3, %v4946_v15, %v2673_v43  ;;  %v2639_v16 = vadd.f32 %v2569_v48, %v2479_v4  ;;  %v2567_v55 = vpop.permute.xlu1 %2566 }
 0x2e2   : > { %2738 = vst.msk [vmem:[%s5169_s21 + $0xd8] sm:$0xff] %vm529_vm0, %v2706_v54  ;;  %v2705_v49 = vsel %vm2678_vm3, %v5020_v23, %v2672_v38  ;;  %v2638_v35 = vadd.f32 %v2567_v55, %v2478_v25  ;;  %v2482_v23 = vadd.f32 %v5028_v62, %v4925_v24 }
 0x2e3   : > { %2737 = vst.msk [vmem:[%s5169_s21 + $0xd0] sm:$0xff] %vm529_vm0, %v2705_v49  ;;  %v2671_v34 = vmax.f32 %v2639_v16, 0.0 }
 0x2e4   : > { %v2670_v42 = vmax.f32 %v2638_v35, 0.0 }
 0x2e5   : > { %v2704_v58 = vsel %vm2678_vm3, %v4957_v1, %v2671_v34 }
 0x2e6   : > { %2736 = vst.msk [vmem:[%s5169_s21 + $0xc8] sm:$0xff] %vm529_vm0, %v2704_v58  ;;  %v2703_v15 = vsel %vm2678_vm3, %v5022_v31, %v2670_v42  ;;  %v2484_v31 = vadd.f32 %v5028_v62, %v5554_v29 }
 0x2e7   : > { %2735 = vst.msk [vmem:[%s5169_s21 + $0xc0] sm:$0xff] %vm529_vm0, %v2703_v15 }
 0x2e8   : > { %v2577_v2 = vpop.permute.xlu0 %2576 }
 0x2e9   : > { %v2643_v56 = vadd.f32 %v2577_v2, %v2483_v39  ;;  %v2575_v1 = vpop.permute.xlu1 %2574 }
 0x2ea   : > { %v2642_v37 = vadd.f32 %v2575_v1, %v2482_v23 }
 0x2eb   : > { %v2675_v53 = vmax.f32 %v2643_v56, 0.0 }
 0x2ec   : > { %v2674_v19 = vmax.f32 %v2642_v37, 0.0  ;;  %v2581_v6 = vpop.permute.xlu0 %2580 }
 0x2ed   : > { %v2708_v22 = vsel %vm2678_vm3, %v5015_v26, %v2675_v53  ;;  %v2645_v24 = vadd.f32 %v2581_v6, %v2485_v60  ;;  %v2579_v45 = vpop.permute.xlu1 %2578 }
 0x2ee   : > { %2740 = vst.msk [vmem:[%s5169_s21 + $0xe8] sm:$0xff] %vm529_vm0, %v2708_v22  ;;  %v2707_v59 = vsel %vm2678_vm3, %v5024_v11, %v2674_v19  ;;  %v2644_v33 = vadd.f32 %v2579_v45, %v2484_v31 }
 0x2ef   : > { %2739 = vst.msk [vmem:[%s5169_s21 + $0xe0] sm:$0xff] %vm529_vm0, %v2707_v59  ;;  %v2677_v51 = vmax.f32 %v2645_v24, 0.0 }
 0x2f0   : > { %v2676_v62 = vmax.f32 %v2644_v33, 0.0 }
 0x2f1   : > { %v2710_v26 = vsel %vm2678_vm3, %v5010_v44, %v2677_v51 }
 0x2f2   : > { %2742 = vst.msk [vmem:[%s5169_s21 + $0xf8] sm:$0xff] %vm529_vm0, %v2710_v26  ;;  %v2709_v11 = vsel %vm2678_vm3, %v5026_v27, %v2676_v62 }
 0x2f3   : > { %2741 = vst.msk [vmem:[%s5169_s21 + $0xf0] sm:$0xff] %vm529_vm0, %v2709_v11 }
 0x2f4   : > { %3691 = shalt.err (!%p3688_p11)
}
 0x2f5   : > { %s3692_s19 = scalar_lea.hbm %s5350_s23, 4096  ;;  %s3696_s26 = scalar_lea.hbm %s5412_s8, 8192 }
 0x2f6   : > { %p3693_p3 = scmp.ne.s32.totalorder %s5350_s23, %s3692_s19  ;;  %p3697_p2 = scmp.lt.u32.totalorder %s5350_s23, %s5412_s8 }
 0x2f7   : > { %p3698_p4 = scmp.lt.u32.totalorder %s3696_s26, %s3692_s19  ;;  %p3700_p13 = scmp.lt.u32.totalorder %s3692_s19, %s5350_s23 }
 0x2f8   : > { %p3694_p8 = pnand %p3693_p3, %p5555_p1 }
 0x2f9   : > { %p3699_p6 = por %p3698_p4, %p3697_p2 }
 0x2fa   : > { %p3695_p0 = pneg %p3694_p8 }
 0x2fb   : > { %p3701_p12 = por %p3700_p13, %p3699_p6 }
 0x2fd   : > { %p3702_p10 = pnand %p3701_p12, %p3695_p0 }
 0x2ff   : > { %3705 = shalt.err (!%p3702_p10)
}
 0x300   : > { %s3757_s29 = smov 128   ;;  %s3758_s22 = smov 8  }
 0x301   : > { %3513 = dma.vmem_to_hbm [thread:$0]  (%p5555_p1), %s5352_s12, 4096, %s5350_s23, %s2744_s9, %s3757_s29, %s3757_s29, %s3758_s22  }
 0x302 PF: > { %s2772_s14 = sand.u32 1, %s3736_s27   ;;  %p5556_p5 = scmp.ne.s32.totalorder %s5435_s17, 0 }
 0x303   : > { %p5557_p7 = scmp.ge.s32.totalorder %s3748_s30, 2  ;;  %s2773_s0 = scalar_lea.sflag [#allocation4], %s2772_s14 }
 0x305   : > { %p3523_p9 = pnand %p5557_p7, %p5556_p5 }
 0x307   : > { %3731 = dma.done.wait (!%p3523_p9), %s2773_s0, 4096  }
 0x308   : > { %3733 = vsyncadd (!%p3523_p9), %s2773_s0, 4294963200  ;;  %s5558_s20 = sld [smem:[#allocation11_spill]]  ;;  %s5559_s29 = sld [smem:[#allocation12_spill]] }
 0x309   : > { %p24_p11 = scmp.ge.s32.totalorder %s3829_s11, 4   ;;  %s5560_s27 = smov %s3740_s28 }
 0x30a   : > { %s5562_s30 = smov %s3829_s11 }
 0x30b   :  { %26 = sbr.rel (!%p24_p11) target bundleno = 9 (0x9), region = 110 }
 0x30e   : > { %s5561_s28 = smov %s5558_s20 }
 0x312   :  { %2778 = vsyncpa [#allocation3], 1 }
 0x313   :  { %2780 = vsyncpa [#allocation3 + $0x1], 1 }
 0x314   :  { %2781 = vsyncpa [#allocation6], 1 }
 0x315   :  { %2783 = vsyncpa [#allocation6 + $0x1], 1 }
 0x316   :  { %2784 = vsyncpa [#allocation4], 1 }
 0x317   :  { %2786 = vsyncpa [#allocation4 + $0x1], 1 }

</bundles_post_ra>
